<compile_context>
chip_gen: v6e
topology: v6e:2x2x1
jax: 0.10.0
libtpu: 0.0.40
codegen_flags: <defaults>
</compile_context>

<pallas_src>
import jax
import jax.numpy as jnp
import numpy as np
from jax import lax
from jax.experimental import pallas as pl
from jax.experimental.pallas import tpu as pltpu


def bottleneck_ap_kernel(x_ref, halo_ref, w1_ref, b1_ref, w2_ref, b2_ref,
                         w3_ref, b3_ref, o_ref, pad_ref):
    """One (batch image, TH-row) tile of the bottleneck forward.

    x_ref:    (1, TH, W, Cin)     NHWC input tile
    halo_ref: (1, 1, 2, W, Cin)   x rows just above / below the tile
    w1_ref:   (Cin, width)        1x1 conv, BN1 scale folded in
    w2_ref:   (9*width, width)    3x3 conv as im2col weight, BN2 scale folded in
    w3_ref:   (width, Cout)       1x1 conv, BN3 scale folded in
    b*_ref:   (1, C)              folded BN biases (f32)
    o_ref:    (1, TH, W, Cout)
    pad_ref:  (TH+2, W+2, width)  VMEM scratch: zero-padded conv2 input
    """
    _, TH, W, Cin = x_ref.shape
    width = w1_ref.shape[1]
    Cout = w3_ref.shape[1]
    P = TH * W
    cd = w1_ref.dtype            # matmul compute dtype (f32 or bf16)
    f32 = jnp.float32

    t = pl.program_id(1)

    # ---- conv1 (1x1, BN1 scale folded into weights) + bias + relu ----
    x_tile = x_ref[0].reshape(P, Cin)
    out1 = jnp.dot(x_tile.astype(cd), w1_ref[...], preferred_element_type=f32)
    out1 = jnp.maximum(out1 + b1_ref[...], 0.0)

    # conv1 on the two halo rows (row above / below the tile).  Rows that fall
    # outside the image are masked to zero -> exact 'same' zero padding for conv2.
    halo = halo_ref[0, 0].reshape(2 * W, Cin)
    h1 = jnp.dot(halo.astype(cd), w1_ref[...], preferred_element_type=f32)
    h1 = jnp.maximum(h1 + b1_ref[...], 0.0).reshape(2, W, width)
    top = h1[0:1] * (t > 0).astype(f32)
    bot = h1[1:2] * (t < pl.num_programs(1) - 1).astype(f32)

    # ---- conv2 (3x3, stride 1, pad 1) as ONE matmul with K = 9*width ----
    # Only the two 1-column W borders of the scratch need (re)zeroing; the
    # interior and both halo rows are overwritten every tile, so the scratch is
    # correct regardless of grid iteration order / core assignment.
    zcol = jnp.zeros((TH + 2, 1, width), f32)
    pad_ref[:, 0:1, :] = zcol
    pad_ref[:, W + 1:W + 2, :] = zcol
    pad_ref[1:TH + 1, 1:W + 1, :] = out1.reshape(TH, W, width)
    pad_ref[0:1, 1:W + 1, :] = top
    pad_ref[TH + 1:TH + 2, 1:W + 1, :] = bot

    taps = [pad_ref[ky:ky + TH, kx:kx + W, :].reshape(P, width)
            for ky in range(3) for kx in range(3)]
    patches = jnp.concatenate(taps, axis=-1)                      # (P, 9*width) im2col
    out2 = jnp.dot(patches.astype(cd), w2_ref[...], preferred_element_type=f32)
    out2 = jnp.maximum(out2 + b2_ref[...], 0.0)

    # pool = nn.Identity()  (stride == 1)

    # ---- conv3 (1x1, BN3 scale folded) + bias ----
    out3 = jnp.dot(out2.astype(cd), w3_ref[...], preferred_element_type=f32)
    out3 = out3 + b3_ref[...]

    # ---- residual add (identity = x, re-read right before use) + relu ----
    identity = x_ref[0].reshape(P, Cin).astype(f32)
    out = jnp.maximum(out3 + identity, 0.0)
    o_ref[...] = out.reshape(1, TH, W, Cout).astype(o_ref.dtype)


def bottleneck_ap_pallas(x_nchw, params, *, tile_h=8, compute_dtype=jnp.float32):
    """NCHW in / NCHW out, matching the PyTorch module (stride=1, downsample=None)."""
    w1s, b1, w2s, b2, w3s, b3 = params
    N, Cin, H, W = x_nchw.shape
    width = w1s.shape[1]
    Cout = w3s.shape[1]
    assert Cin == Cout, ("residual add requires inplanes == planes*expansion "
                         "when downsample is None")
    TH = tile_h if H % tile_h == 0 else H
    T = H // TH

    # TODO(synk): keep activations NHWC end-to-end across blocks so these two
    # wrapper transposes (full HBM round trips) disappear in a real pipeline.
    x_nhwc = jnp.transpose(x_nchw, (0, 2, 3, 1)).astype(jnp.float32)

    # Halo rows for the 3x3 conv: the row above and below every H-row tile
    # (clamped at the image border; the kernel masks those rows to zero).
    rows0 = jnp.arange(T) * TH
    top = x_nhwc[:, jnp.clip(rows0 - 1, 0, H - 1)]   # (N, T, W, Cin)
    bot = x_nhwc[:, jnp.clip(rows0 + TH, 0, H - 1)]  # (N, T, W, Cin)
    halo = jnp.stack([top, bot], axis=2)             # (N, T, 2, W, Cin)

    # Weights in matmul compute dtype (bf16 halves VMEM/HBM weight traffic on
    # v6e/v7x); biases and all elementwise math stay f32 (no bf16 VPU on v5e).
    w1c = w1s.astype(compute_dtype)
    w2c = w2s.astype(compute_dtype)
    w3c = w3s.astype(compute_dtype)

    flops = 2 * N * H * W * (Cin * width + 9 * width * width + width * Cout)
    bytes_accessed = int(
        x_nhwc.size * 4 + halo.size * 4 + N * H * W * Cout * 4
        + (w1c.size + w2c.size + w3c.size) * jnp.dtype(compute_dtype).itemsize
        + (b1.size + b2.size + b3.size) * 4)

    grid_spec = pltpu.PrefetchScalarGridSpec(
        num_scalar_prefetch=0,
        grid=(N, T),
        in_specs=[
            pl.BlockSpec((1, TH, W, Cin), lambda n, t: (n, t, 0, 0)),        # x tile
            pl.BlockSpec((1, 1, 2, W, Cin), lambda n, t: (n, t, 0, 0, 0)),   # halo rows
            pl.BlockSpec((Cin, width), lambda n, t: (0, 0)),                 # w1 (folded)
            pl.BlockSpec((1, width), lambda n, t: (0, 0)),                   # b1
            pl.BlockSpec((9 * width, width), lambda n, t: (0, 0)),           # w2 (im2col)
            pl.BlockSpec((1, width), lambda n, t: (0, 0)),                   # b2
            pl.BlockSpec((width, Cout), lambda n, t: (0, 0)),                # w3 (folded)
            pl.BlockSpec((1, Cout), lambda n, t: (0, 0)),                    # b3
        ],
        out_specs=pl.BlockSpec((1, TH, W, Cout), lambda n, t: (n, t, 0, 0)),
        scratch_shapes=[pltpu.VMEM((TH + 2, W + 2, width), jnp.float32)],
    )

    out_nhwc = pl.pallas_call(
        bottleneck_ap_kernel,
        out_shape=jax.ShapeDtypeStruct((N, H, W, Cout), jnp.float32),
        grid_spec=grid_spec,
        compiler_params=pltpu.CompilerParams(
            dimension_semantics=("parallel", "parallel"),
            vmem_limit_bytes=32 * 1024 * 1024),
        cost_estimate=pl.CostEstimate(flops=flops, transcendentals=0,
                                      bytes_accessed=bytes_accessed),
    )(x_nhwc, halo, w1c, b1, w2c, b2, w3c, b3)

    return jnp.transpose(out_nhwc, (0, 3, 1, 2))


# ---------------------------------------------------------------------------
# Parameter construction (deterministic, mirrors the PyTorch module's shapes)
# ---------------------------------------------------------------------------
def fold_bn(gamma, beta, mean, var, eps=1e-5):
    s = gamma / jnp.sqrt(var + eps)
    b = beta - mean * s
    return s.astype(jnp.float32), b.astype(jnp.float32)


def make_params(key, inplanes, planes, groups=1, base_width=64, expansion=4):
    width = int(planes * (base_width / 64.0)) * groups
    cout = planes * expansion
    ks = jax.random.split(key, 6)

    # conv weights in PyTorch layout (out, in, kh, kw)
    w1_t = jax.random.normal(ks[0], (width, inplanes, 1, 1), jnp.float32) * 0.2
    w2_t = jax.random.normal(ks[1], (width, width, 3, 3), jnp.float32) * 0.2
    w3_t = jax.random.normal(ks[2], (cout, width, 1, 1), jnp.float32) * 0.2

    def bn_params(k, c):
        k1, k2, k3, k4 = jax.random.split(k, 4)
        gamma = jax.random.uniform(k1, (c,), jnp.float32, 0.5, 1.5)
        beta = jax.random.normal(k2, (c,), jnp.float32) * 0.1
        mean = jax.random.normal(k3, (c,), jnp.float32) * 0.1
        var = jax.random.uniform(k4, (c,), jnp.float32, 0.5, 1.5)
        return gamma, beta, mean, var

    bn1 = bn_params(ks[3], width)
    bn2 = bn_params(ks[4], width)
    bn3 = bn_params(ks[5], cout)
    s1, b1 = fold_bn(*bn1)
    s2, b2 = fold_bn(*bn2)
    s3, b3 = fold_bn(*bn3)

    # Kernel layout, BN scale folded into the conv weights (output-channel scale).
    w1s = jnp.transpose(w1_t[:, :, 0, 0], (1, 0)) * s1[None, :]            # (Cin, width)
    w2_taps = jnp.stack([jnp.transpose(w2_t[:, :, ky, kx], (1, 0))
                         for ky in range(3) for kx in range(3)], axis=0)   # (9, width, width)
    w2s = w2_taps.reshape(9 * width, width) * s2[None, :]                  # (9*width, width)
    w3s = jnp.transpose(w3_t[:, :, 0, 0], (1, 0)) * s3[None, :]            # (width, cout)

    kernel_params = (w1s, b1.reshape(1, -1), w2s, b2.reshape(1, -1),
                     w3s, b3.reshape(1, -1))
    torch_layout = (w1_t, w2_t, w3_t, (s1, b1), (s2, b2), (s3, b3))
    return kernel_params, torch_layout


# ---------------------------------------------------------------------------
# Pure-JAX reference (correctness check)
# ---------------------------------------------------------------------------
def reference(x_nchw, torch_layout):
    w1_t, w2_t, w3_t, (s1, b1), (s2, b2), (s3, b3) = torch_layout
    x = jnp.transpose(x_nchw, (0, 2, 3, 1))  # NHWC
    dn = ('NHWC', 'HWIO', 'NHWC')

    def conv(inp, w_oihw, pad):
        k = jnp.transpose(w_oihw, (2, 3, 1, 0))  # HWIO
        return lax.conv_general_dilated(inp, k, (1, 1), pad, dimension_numbers=dn)

    out = jnp.maximum(conv(x, w1_t, 'VALID') * s1 + b1, 0.0)
    out = jnp.maximum(conv(out, w2_t, 'SAME') * s2 + b2, 0.0)
    out = conv(out, w3_t, 'VALID') * s3 + b3
    out = jnp.maximum(out + x, 0.0)
    return jnp.transpose(out, (0, 3, 1, 2))


if __name__ == "__main__":
    key = jax.random.PRNGKey(0)
    kx, kp = jax.random.split(key)

    # Small valid config: inplanes == planes * expansion, stride=1, downsample=None
    N, H, W = 2, 16, 16
    planes = 4
    inplanes = planes * 4  # 16

    x = jax.random.normal(kx, (N, inplanes, H, W), jnp.float32)
    kernel_params, torch_layout = make_params(kp, inplanes, planes)
    ref = reference(x, torch_layout)

    # f32 matmul path (tile_h=8 -> 2 row tiles per image, exercises the halo path)
    out = jax.block_until_ready(bottleneck_ap_pallas(x, kernel_params, tile_h=8))
    np.testing.assert_allclose(np.asarray(out), np.asarray(ref), rtol=2e-4, atol=2e-4)

    # bf16 matmul path (v6e/v7x MXU; f32 accumulation + f32 elementwise)
    out_bf16 = jax.block_until_ready(
        bottleneck_ap_pallas(x, kernel_params, tile_h=8, compute_dtype=jnp.bfloat16))
    np.testing.assert_allclose(np.asarray(out_bf16), np.asarray(ref),
                               rtol=1e-1, atol=1e-1)

    print("KERNEL_OK")
</pallas_src>

<mosaic_0001>
module attributes {stable_mosaic.version = 11 : i64} {
  func.func @bottleneck_ap_kernel(%arg0: i32, %arg1: i32, %arg2: memref<1x8x16x16xf32, #tpu.memory_space<vmem>>, %arg3: memref<1x1x2x16x16xf32, #tpu.memory_space<vmem>>, %arg4: memref<16x4xf32, #tpu.memory_space<vmem>>, %arg5: memref<1x4xf32, #tpu.memory_space<vmem>>, %arg6: memref<36x4xf32, #tpu.memory_space<vmem>>, %arg7: memref<1x4xf32, #tpu.memory_space<vmem>>, %arg8: memref<4x16xf32, #tpu.memory_space<vmem>>, %arg9: memref<1x16xf32, #tpu.memory_space<vmem>>, %arg10: memref<1x8x16x16xf32, #tpu.memory_space<vmem>>, %arg11: memref<10x18x4xf32, #tpu.memory_space<vmem>>) attributes {dimension_semantics = [#tpu.dimension_semantics<parallel>, #tpu.dimension_semantics<parallel>], iteration_bounds = array<i64: 2, 2>, scalar_prefetch = 0 : i64, scratch_operands = 1 : i64, tpu.core_type = #tpu.core_type<tc>, window_params = [{transform_indices = @transform_0, window_bounds = array<i64: 1, 8, 16, 16>}, {transform_indices = @transform_1, window_bounds = array<i64: 1, 1, 2, 16, 16>}, {pipeline_mode = #tpu.pipeline_mode<synchronous>, transform_indices = @transform_2, window_bounds = array<i64: 16, 4>}, {pipeline_mode = #tpu.pipeline_mode<synchronous>, transform_indices = @transform_3, window_bounds = array<i64: 1, 4>}, {pipeline_mode = #tpu.pipeline_mode<synchronous>, transform_indices = @transform_4, window_bounds = array<i64: 36, 4>}, {pipeline_mode = #tpu.pipeline_mode<synchronous>, transform_indices = @transform_5, window_bounds = array<i64: 1, 4>}, {pipeline_mode = #tpu.pipeline_mode<synchronous>, transform_indices = @transform_6, window_bounds = array<i64: 4, 16>}, {pipeline_mode = #tpu.pipeline_mode<synchronous>, transform_indices = @transform_7, window_bounds = array<i64: 1, 16>}, {transform_indices = @transform_8, window_bounds = array<i64: 1, 8, 16, 16>}]} {
    %c0 = arith.constant 0 : index
    %c0_0 = arith.constant 0 : index
    %c0_1 = arith.constant 0 : index
    %c0_2 = arith.constant 0 : index
    %0 = vector.load %arg2[%c0, %c0_0, %c0_1, %c0_2] : memref<1x8x16x16xf32, #tpu.memory_space<vmem>>, vector<1x8x16x16xf32>
    %1 = vector.shape_cast %0 : vector<1x8x16x16xf32> to vector<8x16x16xf32>
    %2 = vector.shape_cast %1 : vector<8x16x16xf32> to vector<128x16xf32>
    %c0_3 = arith.constant 0 : index
    %c0_4 = arith.constant 0 : index
    %3 = vector.load %arg4[%c0_3, %c0_4] : memref<16x4xf32, #tpu.memory_space<vmem>>, vector<16x4xf32>
    %cst = arith.constant dense<0.000000e+00> : vector<128x4xf32>
    %4 = tpu.matmul %2, %3, %cst {dimension_numbers = #tpu.dot_dimension_numbers<[1], [0], [0], [1], [0, 0, 1, 1], [], []>} : vector<128x16xf32>, vector<16x4xf32>, vector<128x4xf32> -> vector<128x4xf32>
    %c0_5 = arith.constant 0 : index
    %c0_6 = arith.constant 0 : index
    %5 = vector.load %arg5[%c0_5, %c0_6] : memref<1x4xf32, #tpu.memory_space<vmem>>, vector<1x4xf32>
    %6 = vector.broadcast %5 : vector<1x4xf32> to vector<128x4xf32>
    %7 = arith.addf %4, %6 : vector<128x4xf32>
    %cst_7 = arith.constant 0.000000e+00 : f32
    %8 = vector.broadcast %cst_7 : f32 to vector<128x4xf32>
    %9 = arith.maximumf %7, %8 : vector<128x4xf32>
    %c0_8 = arith.constant 0 : index
    %c0_9 = arith.constant 0 : index
    %c0_10 = arith.constant 0 : index
    %c0_11 = arith.constant 0 : index
    %c0_12 = arith.constant 0 : index
    %10 = vector.load %arg3[%c0_8, %c0_9, %c0_10, %c0_11, %c0_12] : memref<1x1x2x16x16xf32, #tpu.memory_space<vmem>>, vector<1x1x2x16x16xf32>
    %11 = vector.shape_cast %10 : vector<1x1x2x16x16xf32> to vector<2x16x16xf32>
    %12 = vector.shape_cast %11 : vector<2x16x16xf32> to vector<32x16xf32>
    %c0_13 = arith.constant 0 : index
    %c0_14 = arith.constant 0 : index
    %13 = vector.load %arg4[%c0_13, %c0_14] : memref<16x4xf32, #tpu.memory_space<vmem>>, vector<16x4xf32>
    %cst_15 = arith.constant dense<0.000000e+00> : vector<32x4xf32>
    %14 = tpu.matmul %12, %13, %cst_15 {dimension_numbers = #tpu.dot_dimension_numbers<[1], [0], [0], [1], [0, 0, 1, 1], [], []>} : vector<32x16xf32>, vector<16x4xf32>, vector<32x4xf32> -> vector<32x4xf32>
    %c0_16 = arith.constant 0 : index
    %c0_17 = arith.constant 0 : index
    %15 = vector.load %arg5[%c0_16, %c0_17] : memref<1x4xf32, #tpu.memory_space<vmem>>, vector<1x4xf32>
    %16 = vector.broadcast %15 : vector<1x4xf32> to vector<32x4xf32>
    %17 = arith.addf %14, %16 : vector<32x4xf32>
    %cst_18 = arith.constant 0.000000e+00 : f32
    %18 = vector.broadcast %cst_18 : f32 to vector<32x4xf32>
    %19 = arith.maximumf %17, %18 : vector<32x4xf32>
    %20 = vector.shape_cast %19 : vector<32x4xf32> to vector<2x16x4xf32>
    %21 = vector.extract_strided_slice %20 {offsets = [0, 0, 0], sizes = [1, 16, 4], strides = [1, 1, 1]} : vector<2x16x4xf32> to vector<1x16x4xf32>
    %c0_i32 = arith.constant 0 : i32
    %22 = arith.cmpi sgt, %arg1, %c0_i32 : i32
    %23 = arith.extui %22 : i1 to i32
    %24 = arith.sitofp %23 : i32 to f32
    %25 = vector.broadcast %24 : f32 to vector<1x16x4xf32>
    %26 = arith.mulf %21, %25 : vector<1x16x4xf32>
    %27 = vector.extract_strided_slice %20 {offsets = [1, 0, 0], sizes = [1, 16, 4], strides = [1, 1, 1]} : vector<2x16x4xf32> to vector<1x16x4xf32>
    %c1_i32 = arith.constant 1 : i32
    %28 = arith.cmpi slt, %arg1, %c1_i32 : i32
    %29 = arith.extui %28 : i1 to i32
    %30 = arith.sitofp %29 : i32 to f32
    %31 = vector.broadcast %30 : f32 to vector<1x16x4xf32>
    %32 = arith.mulf %27, %31 : vector<1x16x4xf32>
    %cst_19 = arith.constant 0.000000e+00 : f32
    %33 = vector.broadcast %cst_19 : f32 to vector<10x1x4xf32>
    %c0_20 = arith.constant 0 : index
    %c0_21 = arith.constant 0 : index
    %c0_22 = arith.constant 0 : index
    %34 = vector.load %arg11[%c0_20, %c0_21, %c0_22] : memref<10x18x4xf32, #tpu.memory_space<vmem>>, vector<10x1x4xf32>
    tpu.vector_store %arg11[%c0_20, %c0_21, %c0_22], %33 {strides = array<i32>} : memref<10x18x4xf32, #tpu.memory_space<vmem>>, vector<10x1x4xf32>,
    %c0_23 = arith.constant 0 : index
    %c17 = arith.constant 17 : index
    %c0_24 = arith.constant 0 : index
    %35 = vector.load %arg11[%c0_23, %c17, %c0_24] : memref<10x18x4xf32, #tpu.memory_space<vmem>>, vector<10x1x4xf32>
    tpu.vector_store %arg11[%c0_23, %c17, %c0_24], %33 {strides = array<i32>} : memref<10x18x4xf32, #tpu.memory_space<vmem>>, vector<10x1x4xf32>,
    %36 = vector.shape_cast %9 : vector<128x4xf32> to vector<8x16x4xf32>
    %c1 = arith.constant 1 : index
    %c1_25 = arith.constant 1 : index
    %c0_26 = arith.constant 0 : index
    %37 = vector.load %arg11[%c1, %c1_25, %c0_26] : memref<10x18x4xf32, #tpu.memory_space<vmem>>, vector<8x16x4xf32>
    tpu.vector_store %arg11[%c1, %c1_25, %c0_26], %36 {strides = array<i32>} : memref<10x18x4xf32, #tpu.memory_space<vmem>>, vector<8x16x4xf32>,
    %c0_27 = arith.constant 0 : index
    %c1_28 = arith.constant 1 : index
    %c0_29 = arith.constant 0 : index
    %38 = vector.load %arg11[%c0_27, %c1_28, %c0_29] : memref<10x18x4xf32, #tpu.memory_space<vmem>>, vector<1x16x4xf32>
    tpu.vector_store %arg11[%c0_27, %c1_28, %c0_29], %26 {strides = array<i32>} : memref<10x18x4xf32, #tpu.memory_space<vmem>>, vector<1x16x4xf32>,
    %c9 = arith.constant 9 : index
    %c1_30 = arith.constant 1 : index
    %c0_31 = arith.constant 0 : index
    %39 = vector.load %arg11[%c9, %c1_30, %c0_31] : memref<10x18x4xf32, #tpu.memory_space<vmem>>, vector<1x16x4xf32>
    tpu.vector_store %arg11[%c9, %c1_30, %c0_31], %32 {strides = array<i32>} : memref<10x18x4xf32, #tpu.memory_space<vmem>>, vector<1x16x4xf32>,
    %c0_32 = arith.constant 0 : index
    %c0_33 = arith.constant 0 : index
    %c0_34 = arith.constant 0 : index
    %40 = vector.load %arg11[%c0_32, %c0_33, %c0_34] : memref<10x18x4xf32, #tpu.memory_space<vmem>>, vector<8x16x4xf32>
    %41 = vector.shape_cast %40 : vector<8x16x4xf32> to vector<128x4xf32>
    %c0_35 = arith.constant 0 : index
    %c1_36 = arith.constant 1 : index
    %c0_37 = arith.constant 0 : index
    %42 = vector.load %arg11[%c0_35, %c1_36, %c0_37] : memref<10x18x4xf32, #tpu.memory_space<vmem>>, vector<8x16x4xf32>
    %43 = vector.shape_cast %42 : vector<8x16x4xf32> to vector<128x4xf32>
    %c0_38 = arith.constant 0 : index
    %c2 = arith.constant 2 : index
    %c0_39 = arith.constant 0 : index
    %44 = vector.load %arg11[%c0_38, %c2, %c0_39] : memref<10x18x4xf32, #tpu.memory_space<vmem>>, vector<8x16x4xf32>
    %45 = vector.shape_cast %44 : vector<8x16x4xf32> to vector<128x4xf32>
    %c1_40 = arith.constant 1 : index
    %c0_41 = arith.constant 0 : index
    %c0_42 = arith.constant 0 : index
    %46 = vector.load %arg11[%c1_40, %c0_41, %c0_42] : memref<10x18x4xf32, #tpu.memory_space<vmem>>, vector<8x16x4xf32>
    %47 = vector.shape_cast %46 : vector<8x16x4xf32> to vector<128x4xf32>
    %c1_43 = arith.constant 1 : index
    %c1_44 = arith.constant 1 : index
    %c0_45 = arith.constant 0 : index
    %48 = vector.load %arg11[%c1_43, %c1_44, %c0_45] : memref<10x18x4xf32, #tpu.memory_space<vmem>>, vector<8x16x4xf32>
    %49 = vector.shape_cast %48 : vector<8x16x4xf32> to vector<128x4xf32>
    %c1_46 = arith.constant 1 : index
    %c2_47 = arith.constant 2 : index
    %c0_48 = arith.constant 0 : index
    %50 = vector.load %arg11[%c1_46, %c2_47, %c0_48] : memref<10x18x4xf32, #tpu.memory_space<vmem>>, vector<8x16x4xf32>
    %51 = vector.shape_cast %50 : vector<8x16x4xf32> to vector<128x4xf32>
    %c2_49 = arith.constant 2 : index
    %c0_50 = arith.constant 0 : index
    %c0_51 = arith.constant 0 : index
    %52 = vector.load %arg11[%c2_49, %c0_50, %c0_51] : memref<10x18x4xf32, #tpu.memory_space<vmem>>, vector<8x16x4xf32>
    %53 = vector.shape_cast %52 : vector<8x16x4xf32> to vector<128x4xf32>
    %c2_52 = arith.constant 2 : index
    %c1_53 = arith.constant 1 : index
    %c0_54 = arith.constant 0 : index
    %54 = vector.load %arg11[%c2_52, %c1_53, %c0_54] : memref<10x18x4xf32, #tpu.memory_space<vmem>>, vector<8x16x4xf32>
    %55 = vector.shape_cast %54 : vector<8x16x4xf32> to vector<128x4xf32>
    %c2_55 = arith.constant 2 : index
    %c2_56 = arith.constant 2 : index
    %c0_57 = arith.constant 0 : index
    %56 = vector.load %arg11[%c2_55, %c2_56, %c0_57] : memref<10x18x4xf32, #tpu.memory_space<vmem>>, vector<8x16x4xf32>
    %57 = vector.shape_cast %56 : vector<8x16x4xf32> to vector<128x4xf32>
    %58 = tpu.concatenate %41, %43, %45, %47, %49, %51, %53, %55, %57 in 1 : vector<128x4xf32>, vector<128x4xf32>, vector<128x4xf32>, vector<128x4xf32>, vector<128x4xf32>, vector<128x4xf32>, vector<128x4xf32>, vector<128x4xf32>, vector<128x4xf32> -> vector<128x36xf32>
    %c0_58 = arith.constant 0 : index
    %c0_59 = arith.constant 0 : index
    %59 = vector.load %arg6[%c0_58, %c0_59] : memref<36x4xf32, #tpu.memory_space<vmem>>, vector<36x4xf32>
    %cst_60 = arith.constant dense<0.000000e+00> : vector<128x4xf32>
    %60 = tpu.matmul %58, %59, %cst_60 {dimension_numbers = #tpu.dot_dimension_numbers<[1], [0], [0], [1], [0, 0, 1, 1], [], []>} : vector<128x36xf32>, vector<36x4xf32>, vector<128x4xf32> -> vector<128x4xf32>
    %c0_61 = arith.constant 0 : index
    %c0_62 = arith.constant 0 : index
    %61 = vector.load %arg7[%c0_61, %c0_62] : memref<1x4xf32, #tpu.memory_space<vmem>>, vector<1x4xf32>
    %62 = vector.broadcast %61 : vector<1x4xf32> to vector<128x4xf32>
    %63 = arith.addf %60, %62 : vector<128x4xf32>
    %cst_63 = arith.constant 0.000000e+00 : f32
    %64 = vector.broadcast %cst_63 : f32 to vector<128x4xf32>
    %65 = arith.maximumf %63, %64 : vector<128x4xf32>
    %c0_64 = arith.constant 0 : index
    %c0_65 = arith.constant 0 : index
    %66 = vector.load %arg8[%c0_64, %c0_65] : memref<4x16xf32, #tpu.memory_space<vmem>>, vector<4x16xf32>
    %cst_66 = arith.constant dense<0.000000e+00> : vector<128x16xf32>
    %67 = tpu.matmul %65, %66, %cst_66 {dimension_numbers = #tpu.dot_dimension_numbers<[1], [0], [0], [1], [0, 0, 1, 1], [], []>} : vector<128x4xf32>, vector<4x16xf32>, vector<128x16xf32> -> vector<128x16xf32>
    %c0_67 = arith.constant 0 : index
    %c0_68 = arith.constant 0 : index
    %68 = vector.load %arg9[%c0_67, %c0_68] : memref<1x16xf32, #tpu.memory_space<vmem>>, vector<1x16xf32>
    %69 = vector.broadcast %68 : vector<1x16xf32> to vector<128x16xf32>
    %70 = arith.addf %67, %69 : vector<128x16xf32>
    %c0_69 = arith.constant 0 : index
    %c0_70 = arith.constant 0 : index
    %c0_71 = arith.constant 0 : index
    %c0_72 = arith.constant 0 : index
    %71 = vector.load %arg2[%c0_69, %c0_70, %c0_71, %c0_72] : memref<1x8x16x16xf32, #tpu.memory_space<vmem>>, vector<1x8x16x16xf32>
    %72 = vector.shape_cast %71 : vector<1x8x16x16xf32> to vector<8x16x16xf32>
    %73 = vector.shape_cast %72 : vector<8x16x16xf32> to vector<128x16xf32>
    %74 = arith.addf %70, %73 : vector<128x16xf32>
    %cst_73 = arith.constant 0.000000e+00 : f32
    %75 = vector.broadcast %cst_73 : f32 to vector<128x16xf32>
    %76 = arith.maximumf %74, %75 : vector<128x16xf32>
    %77 = vector.shape_cast %76 : vector<128x16xf32> to vector<1x8x16x16xf32>
    %c0_74 = arith.constant 0 : index
    %c0_75 = arith.constant 0 : index
    %c0_76 = arith.constant 0 : index
    %c0_77 = arith.constant 0 : index
    %78 = vector.load %arg10[%c0_74, %c0_75, %c0_76, %c0_77] : memref<1x8x16x16xf32, #tpu.memory_space<vmem>>, vector<1x8x16x16xf32>
    tpu.vector_store %arg10[%c0_74, %c0_75, %c0_76, %c0_77], %77 {strides = array<i32>} : memref<1x8x16x16xf32, #tpu.memory_space<vmem>>, vector<1x8x16x16xf32>,
    return
  }
  func.func @transform_0(%arg0: i32, %arg1: i32) -> (i32, i32, i32, i32) {
    %c0_i32 = arith.constant 0 : i32
    %c0_i32_0 = arith.constant 0 : i32
    %c0_i32_1 = arith.constant 0 : i32
    return %arg0, %arg1, %c0_i32, %c0_i32_0 : i32, i32, i32, i32
  }
  func.func @transform_1(%arg0: i32, %arg1: i32) -> (i32, i32, i32, i32, i32) {
    %c0_i32 = arith.constant 0 : i32
    %c0_i32_0 = arith.constant 0 : i32
    %c0_i32_1 = arith.constant 0 : i32
    %c0_i32_2 = arith.constant 0 : i32
    return %arg0, %arg1, %c0_i32, %c0_i32_0, %c0_i32_1 : i32, i32, i32, i32, i32
  }
  func.func @transform_2(%arg0: i32, %arg1: i32) -> (i32, i32) {
    %c0_i32 = arith.constant 0 : i32
    %c0_i32_0 = arith.constant 0 : i32
    %c0_i32_1 = arith.constant 0 : i32
    return %c0_i32, %c0_i32_0 : i32, i32
  }
  func.func @transform_3(%arg0: i32, %arg1: i32) -> (i32, i32) {
    %c0_i32 = arith.constant 0 : i32
    %c0_i32_0 = arith.constant 0 : i32
    %c0_i32_1 = arith.constant 0 : i32
    return %c0_i32, %c0_i32_0 : i32, i32
  }
  func.func @transform_4(%arg0: i32, %arg1: i32) -> (i32, i32) {
    %c0_i32 = arith.constant 0 : i32
    %c0_i32_0 = arith.constant 0 : i32
    %c0_i32_1 = arith.constant 0 : i32
    return %c0_i32, %c0_i32_0 : i32, i32
  }
  func.func @transform_5(%arg0: i32, %arg1: i32) -> (i32, i32) {
    %c0_i32 = arith.constant 0 : i32
    %c0_i32_0 = arith.constant 0 : i32
    %c0_i32_1 = arith.constant 0 : i32
    return %c0_i32, %c0_i32_0 : i32, i32
  }
  func.func @transform_6(%arg0: i32, %arg1: i32) -> (i32, i32) {
    %c0_i32 = arith.constant 0 : i32
    %c0_i32_0 = arith.constant 0 : i32
    %c0_i32_1 = arith.constant 0 : i32
    return %c0_i32, %c0_i32_0 : i32, i32
  }
  func.func @transform_7(%arg0: i32, %arg1: i32) -> (i32, i32) {
    %c0_i32 = arith.constant 0 : i32
    %c0_i32_0 = arith.constant 0 : i32
    %c0_i32_1 = arith.constant 0 : i32
    return %c0_i32, %c0_i32_0 : i32, i32
  }
  func.func @transform_8(%arg0: i32, %arg1: i32) -> (i32, i32, i32, i32) {
    %c0_i32 = arith.constant 0 : i32
    %c0_i32_0 = arith.constant 0 : i32
    %c0_i32_1 = arith.constant 0 : i32
    return %arg0, %arg1, %c0_i32, %c0_i32_0 : i32, i32, i32, i32
  }
}

</mosaic_0001>

<bundles_post_ra>
// kernel: tpu_custom_call.1
= control target key start
LH: loop header
LB: loop body
LE: loop exit
PB: predicated region body
PF: predicated region fallthrough
CT: control target
= control target key end

     0   :  { %s3718_s0 = inlined_call_operand.hbm [shape: f32[2,16,16,16], index: 0, kind: input, shape index: {}]   ;;  %s3719_s1 = inlined_call_operand.hbm [shape: f32[2,2,2,16,16], index: 1, kind: input, shape index: {}]   ;;  %s3720_s2 = inlined_call_operand.vmem [shape: f32[16,4], index: 2, kind: input, shape index: {}]   ;;  %s3721_s3 = inlined_call_operand.vmem [shape: f32[1,4], index: 3, kind: input, shape index: {}]   ;;  %s3722_s4 = inlined_call_operand.vmem [shape: f32[36,4], index: 4, kind: input, shape index: {}]   ;;  %s3723_s5 = inlined_call_operand.vmem [shape: f32[1,4], index: 5, kind: input, shape index: {}]   ;;  %s3724_s6 = inlined_call_operand.vmem [shape: f32[4,16], index: 6, kind: input, shape index: {}]   ;;  %s3725_s7 = inlined_call_operand.vmem [shape: f32[1,16], index: 7, kind: input, shape index: {}]   ;;  %s3726_s8 = inlined_call_operand.hbm [shape: f32[2,16,16,16], index: 8, kind: output, shape index: {}]  }
   0x1   :  { %3737 = sst [smem:[#allocation28_spill]] %s3718_s0 }
   0x2   :  { %3738 = sst [smem:[#allocation29_spill]] %s3726_s8 }
   0x3   :  { %13 = vsyncpa [#allocation4], 0 }
   0x4   :  { %15 = vsyncpa [#allocation4 + $0x1], 0 }
   0x5   :  { %16 = vsyncpa [#allocation7], 0 }
   0x6   :  { %18 = vsyncpa [#allocation7 + $0x1], 0 }
   0x7   :  { %19 = vsyncpa [#allocation5], 0 }
   0x8   :  { %21 = vsyncpa [#allocation5 + $0x1], 0  ;;  %s2763_s27 = smov 0   ;;  %s2765_s28 = smov 0  }
   0x9   :  { %s2767_s29 = smov 0   ;;  %s2769_s30 = smov 0  }
   0xa   :  { %s2771_s9 = smov 0   ;;  %s2773_s10 = smov 0  }
   0xb   :  { %s2775_s11 = smov 0   ;;  %s2777_s12 = smov 0  }
   0xc LB: > { %3739 = sst [smem:[#allocation12_spill]] %s2673_s27  ;;  %s2203_s13 = sadd.s32 4294967295, %s2701_s12   ;;  %s2701_s12 = sphi %s2777_s12, %s27_s12   ;;  %s2697_s11 = sphi %s2775_s11, %s3786_s11   ;;  %s2693_s10 = sphi %s2773_s10, %s3785_s10   ;;  %s2689_s9 = sphi %s2771_s9, %s3784_s9   ;;  %s2685_s30 = sphi %s2769_s30, %s3783_s30   ;;  %s2681_s29 = sphi %s2767_s29, %s3778_s29   ;;  %s2677_s28 = sphi %s2765_s28, %s3782_s28   ;;  %s2673_s27 = sphi %s2763_s27, %s3781_s27  }
   0xd   : > { %3740 = sst [smem:[#allocation13_spill]] %s2681_s29  ;;  %s2204_s14 = sadd.s32 4294967294, %s2701_s12  }
   0xe   : > { %3741 = sst [smem:[#allocation14_spill]] %s2689_s9  ;;  %s36_s15 = sadd.s32 1, %s2693_s10 }
   0xf   : > { %s39_s16 = sadd.s32 1, %s2697_s11  ;;  %p37_p0 = scmp.ge.s32.totalorder %s36_s15, 2 }
  0x10   : > { %s48_s17 = sadd.s32 1, %s2681_s29  ;;  %p55_p1 = scmp.ne.s32.totalorder %s2681_s29, %s2677_s28 }
  0x11   : > { %p56_p2 = scmp.eq.s32.totalorder %s2701_s12, 0  ;;  %s3788_s15 = smov (%p37_p0, %s36_s15), 0 }
  0x12   : > { %3742 = sst [smem:[#allocation15_spill]] %s3788_s15  ;;  %s3790_s16 = smov (!%p37_p0, %s39_s16), %s2697_s11 }
  0x13   : > { %s44_s18 = ssub.s32 %s2693_s10, %s3788_s15  ;;  %p2816_p3 = por %p56_p2, %p55_p1 }
  0x14   : > { %p41_p4 = scmp.ge.s32.totalorder %s3790_s16, 2  ;;  %p61_p5 = scmp.ne.s32.totalorder %s2677_s28, %s2673_s27 }
  0x15   : > { %p62_p6 = scmp.eq.s32.totalorder %s2203_s13, 0  ;;  %p241_p7 = scmp.eq.s32.totalorder %s2203_s13, 3 }
  0x16   : > { %s3792_s16 = smov (%p41_p4, %s3790_s16), 0  ;;  %p247_p10 = scmp.eq.s32.totalorder %s2204_s14, 3 }
  0x17   : > { %3744 = sst [smem:[#allocation16_spill]] %s3792_s16  ;;  %p2824_p8 = por %p62_p6, %p61_p5 }
  0x18   : > { %p2828_p9 = por %p241_p7, %p55_p1  ;;  %s43_s22 = ssub.s32 %s2697_s11, %s3792_s16 }
  0x19   : > { %s45_s23 = sor.u32 %s44_s18, %s43_s22  ;;  %p2834_p12 = por %p247_p10, %p61_p5 }
  0x1a   : > { %s3746_s21 = scalar_select %p2828_p9, 1, 0 }
  0x1b   : > { %p46_p11 = scmp.eq.s32.totalorder %s45_s23, 0  ;;  %p2467_p13 = scmp.lt.s32.totalorder %s2701_s12, 4 }
  0x1c   : > { %3747 = sst [smem:[#allocation17_spill]] %s3746_s21  ;;  %s2840_s25 = sand.u32 1, %s2681_s29  }
  0x1d   : > { %s3748_s24 = scalar_select %p2834_p12, 1, 0 }
  0x1e   : > { %s2843_s26 = scalar_select %p46_p11, %s2681_s29, %s48_s17  }
  0x1f   : > { %3749 = sst [smem:[#allocation18_spill]] %s3748_s24  ;;  %s2207_s13 = sshll.u32 %s2840_s25, 7 }
  0x20   : > { %3750 = sst [smem:[#allocation19_spill]] %s2843_s26  ;;  %s2284_s15 = sshll.u32 %s2693_s10, 4 }
  0x21   : > { %s2210_s27 = sshll.u32 %s2697_s11, 5  ;;  %s289_s8 = scalar_lea.vmem [#allocation3], %s2207_s13 }
  0x22   : > { %s299_s16 = sshll.u32 %s289_s8, 4  ;;  %s296_s21 = sadd.s32 %s2284_s15, %s2210_s27  ;;  %s300_s16 = int_to_ptr.vmem [resolvable:$true] %s299_s16 }
  0x23   : > { %s2211_s14 = sshll.u32 %s296_s21, 7  ;;  %p2850_p0 = pnand %p2467_p13, %p2816_p3 }
  0x24   : > { %s3752_s0 = sld [smem:[#allocation28_spill]]  ;;  %s286_s26 = scalar_lea.sflag [#allocation4], %s2840_s25 }
  0x25   : > { %p2547_p1 = pneg %p2850_p0  ;;  %s2558_s29 = scalar_lea.vmem %s300_s16, 2048 }
  0x26   : > { %p2559_p2 = scmp.ne.s32.totalorder %s300_s16, %s2558_s29  ;;  %s2703_s8 = smov [#allocation3]  }
  0x27   : > { %s2563_s27 = sshll.u32 %s2703_s8, 4  ;;  %s2564_s27 = int_to_ptr.vmem [resolvable:$false] %s2563_s27 }
  0x28   : > { %p2561_p4 = pnand %p2559_p2, %p2547_p1  ;;  %s2565_s15 = scalar_lea.vmem %s2564_s27, 4096 }
  0x29   : > { %p2566_p3 = scmp.lt.s32.totalorder %s300_s16, %s2564_s27  ;;  %p2567_p6 = scmp.lt.s32.totalorder %s2565_s15, %s2558_s29 }
  0x2a   : > { %s298_s17 = scalar_lea.hbm %s3752_s0, %s2211_s14  ;;  %p2562_p5 = pneg %p2561_p4 }
  0x2b   : > { %p2568_p7 = por %p2567_p6, %p2566_p3 }
  0x2d   : > { %p2569_p10 = pnand %p2568_p7, %p2562_p5 }
  0x2f   : > { %2572 = shalt.err (!%p2569_p10)
}
  0x30   : > { %s3735_s19 = smov 128   ;;  %s3736_s21 = smov 8  }
  0x31   : > { %2459 = dma.hbm_to_vmem [thread:$0]  (!%p2850_p0), %s298_s17, 2048, %s300_s16, %s286_s26, %s3735_s19, %s3735_s19, %s3736_s21  }
  0x32   : > { %p2216_p11 = scmp.ge.s32.totalorder %s2701_s12, 1  ;;  %p330_p13 = scmp.lt.s32.totalorder %s2701_s12, 5 }
  0x33   : > { %s2212_s29 = sshll.u32 %s2840_s25, 5  ;;  %s2213_s14 = sshll.u32 %s2693_s10, 2 }
  0x34   : > { %p2871_p2 = pnand %p2216_p11, %p330_p13  ;;  %s2214_s22 = sshll.u32 %s2697_s11, 3 }
  0x35   : > { %s319_s23 = sadd.s32 %s2214_s22, %s2213_s14  ;;  %s313_s8 = scalar_lea.vmem [#allocation6], %s2212_s29 }
  0x36   : > { %s322_s27 = sshll.u32 %s313_s8, 4  ;;  %s2215_s15 = sshll.u32 %s319_s23, 7  ;;  %s323_s27 = int_to_ptr.vmem [resolvable:$true] %s322_s27 }
  0x37   : > { %s321_s9 = scalar_lea.hbm %s3719_s1, %s2215_s15  ;;  %s310_s16 = scalar_lea.sflag [#allocation7], %s2840_s25 }
  0x38   : > { %s2586_s26 = scalar_lea.vmem %s323_s27, 512  ;;  %s2706_s17 = smov [#allocation6]  }
  0x39   : > { %p2587_p4 = scmp.ne.s32.totalorder %s323_s27, %s2586_s26  ;;  %s2591_s19 = sshll.u32 %s2706_s17, 4  ;;  %s2592_s19 = int_to_ptr.vmem [resolvable:$false] %s2591_s19 }
  0x3a   : > { %s2593_s21 = scalar_lea.vmem %s2592_s19, 1024  ;;  %p2594_p6 = scmp.lt.s32.totalorder %s323_s27, %s2592_s19 }
  0x3b   : > { %p2589_p5 = pnand %p2587_p4, %p2547_p1  ;;  %p2595_p7 = scmp.lt.s32.totalorder %s2593_s21, %s2586_s26 }
  0x3d   : > { %p2590_p3 = pneg %p2589_p5  ;;  %p2596_p10 = por %p2595_p7, %p2594_p6 }
  0x3f   : > { %p2597_p11 = pnand %p2596_p10, %p2590_p3 }
  0x41   : > { %2600 = shalt.err (!%p2597_p11)
}
  0x42   : > { %s3754_s0 = smov 8   ;;  %s3755_s24 = smov 128  }
  0x43   : > { %2462 = dma.hbm_to_vmem [thread:$0]  (!%p2850_p0), %s321_s9, 512, %s323_s27, %s310_s16, %s3755_s24, %s3755_s24, %s3754_s0  }
  0x44   : > { %334 = sbr.rel (%p2871_p2) target bundleno = 1075 (0x433), region = 52 }
  0x49   : > { %s2892_s25 = sand.u32 1, %s2677_s28  }
  0x4a   : > { %s2217_s19 = sshll.u32 %s2892_s25, 7  ;;  %s337_s21 = scalar_lea.sflag [#allocation4], %s2892_s25 }
  0x4b   : > { %s2898_s29 = scalar_lea.vmem [#allocation3], %s2217_s19 }
  0x4c   : > { %2660 = dma.done.wait (%p2824_p8), %s337_s21, 2048  }
  0x4d   : > { %2662 = vsyncadd (%p2824_p8), %s337_s21, 4294965248  ;;  %s2218_s9 = sshll.u32 %s2892_s25, 5  ;;  %s346_s18 = scalar_lea.sflag [#allocation7], %s2892_s25 }
  0x4e   : > { %s2906_s13 = scalar_lea.vmem [#allocation6], %s2218_s9 }
  0x4f   : > { %2664 = dma.done.wait (%p2824_p8), %s346_s18, 512  }
  0x50   : > { %2666 = vsyncadd (%p2824_p8), %s346_s18, 4294966784  ;;  %v406_v0 = vld [vmem:[%s3720_s2 + $0x8] sm:$0xff]  ;;  %v405_v1 = vld [vmem:[%s3720_s2] sm:$0xff]  ;;  %vm414_vm0 = vcmask 130048   ;;  %vm741_vm1 = vcmask 24576   ;;  %v2707_v18 = vmov 0.0  }
  0x51   : > { %2348 = vmatprep.subr.mxu0 %v406_v0  ;;  %2446 = vmatprep.subr.mxu1 %v406_v0  ;;  %v389_v2 = vld [vmem:[%s2898_s29] sm:$0xff]  ;;  %v390_v4 = vld [vmem:[%s2898_s29 + $0x8] sm:$0xff]  ;;  %v391_v6 = vld [vmem:[%s2898_s29 + $0x10] sm:$0xff]  ;;  %759 = vst.msk [vmem:[#allocation2 + $0xb9] sm:$0x1] %vm741_vm1, %v2707_v18  ;;  %p729_p8 = scmp.gt.s32.totalorder %s2685_s30, 0 }
  0x52   : > { %2349 = vmatpush3.msra.mxu0 %v406_v0  ;;  %2448 = vmatpush3.msra.mxu1 %v406_v0  ;;  %v401_v3 = vld [vmem:[%s2898_s29 + $0x60] sm:$0xff]  ;;  %v402_v5 = vld [vmem:[%s2898_s29 + $0x68] sm:$0xff]  ;;  %v403_v7 = vld [vmem:[%s2898_s29 + $0x70] sm:$0xff]  ;;  %742 = vst.msk [vmem:[#allocation2] sm:$0x1] %vm741_vm1, %v2707_v18  ;;  %vm763_vm2 = vcmask 31744  }
  0x53   : > { %2350 = vmatprep.subr.mxu0 %v405_v1  ;;  %2447 = vmatprep.subr.mxu1 %v405_v1  ;;  %v392_v8 = vld [vmem:[%s2898_s29 + $0x18] sm:$0xff]  ;;  %v393_v10 = vld [vmem:[%s2898_s29 + $0x20] sm:$0xff]  ;;  %v394_v12 = vld [vmem:[%s2898_s29 + $0x28] sm:$0xff]  ;;  %743 = vst.msk [vmem:[#allocation2 + $0x18] sm:$0x1] %vm741_vm1, %v2707_v18  ;;  %s2708_s26 = smov 16  }
  0x54   : > { %2351 = vmatpush3.msra.mxu0 %v405_v1  ;;  %2449 = vmatpush3.msra.mxu1 %v405_v1  ;;  %v404_v9 = vld [vmem:[%s2898_s29 + $0x78] sm:$0xff]  ;;  %v624_v11 = vld [vmem:[%s2906_s13] sm:$0xff]  ;;  %v625_v13 = vld [vmem:[%s2906_s13 + $0x8] sm:$0xff]  ;;  %744 = vst.msk [vmem:[#allocation2 + $0x30] sm:$0x1] %vm741_vm1, %v2707_v18  ;;  %s2709_s17 = smov 32  }
  0x55   : > { %2352 = vmatprep.mubr.msk.f32.mxu0 %vm414_vm0, %v389_v2  ;;  %2370 = vmatprep.mubr.msk.f32.mxu1 %vm414_vm0, %v401_v3  ;;  %v395_v14 = vld [vmem:[%s2898_s29 + $0x30] sm:$0xff]  ;;  %v396_v15 = vld [vmem:[%s2898_s29 + $0x38] sm:$0xff]  ;;  %v397_v16 = vld [vmem:[%s2898_s29 + $0x40] sm:$0xff]  ;;  %745 = vst.msk [vmem:[#allocation2 + $0x48] sm:$0x1] %vm741_vm1, %v2707_v18  ;;  %s2710_s0 = smov 4  }
  0x56   : > { %2353 = vmatmul.mubr.msk.f32.vlgmr.msra.gmra.mxu0 %vm414_vm0, %v390_v4  ;;  %2371 = vmatmul.mubr.msk.f32.vlgmr.msra.gmra.mxu1 %vm414_vm0, %v402_v5  ;;  %v398_v17 = vld [vmem:[%s2898_s29 + $0x48] sm:$0xff]  ;;  %746 = vst.msk [vmem:[#allocation2 + $0x60] sm:$0x1] %vm741_vm1, %v2707_v18  ;;  %747 = vst.msk [vmem:[#allocation2 + $0x78] sm:$0x1] %vm741_vm1, %v2707_v18  ;;  %v399_v19 = vld [vmem:[%s2898_s29 + $0x50] sm:$0xff] }
  0x57   : > { %2355 = vmatprep.mubr.msk.f32.mxu0 %vm414_vm0, %v391_v6  ;;  %2373 = vmatprep.mubr.msk.f32.mxu1 %vm414_vm0, %v403_v7  ;;  %748 = vst.msk [vmem:[#allocation2 + $0x90] sm:$0x1] %vm741_vm1, %v2707_v18  ;;  %749 = vst.msk [vmem:[#allocation2 + $0xa8] sm:$0x1] %vm741_vm1, %v2707_v18  ;;  %v400_v20 = vld [vmem:[%s2898_s29 + $0x58] sm:$0xff]  ;;  %v626_v21 = vld [vmem:[%s2906_s13 + $0x10] sm:$0xff] }
  0x58   : > { %2376 = vmatprep.subr.mxu1 %v406_v0  ;;  %750 = vst.msk [vmem:[#allocation2 + $0xc0] sm:$0x1] %vm741_vm1, %v2707_v18  ;;  %751 = vst.msk [vmem:[#allocation2 + $0xd8] sm:$0x1] %vm741_vm1, %v2707_v18  ;;  %v627_v22 = vld [vmem:[%s2906_s13 + $0x18] sm:$0xff]  ;;  %s2711_s24 = smov 20  }
  0x59   : > { %2377 = vmatpush3.msra.mxu1 %v406_v0  ;;  %752 = vst.msk [vmem:[#allocation2 + $0x11] sm:$0x1] %vm741_vm1, %v2707_v18  ;;  %753 = vst.msk [vmem:[#allocation2 + $0x29] sm:$0x1] %vm741_vm1, %v2707_v18  ;;  %v2981_v23 = vld [vmem:[%s3721_s3] ss:$0 sm:$0xff] }
  0x5a   : > { %2356 = vmatmul.mubr.msk.f32.gmra.mxu0 %vm414_vm0, %v392_v8  ;;  %2374 = vmatmul.mubr.msk.f32.gmra.mxu1 %vm414_vm0, %v404_v9  ;;  %754 = vst.msk [vmem:[#allocation2 + $0x41] sm:$0x1] %vm741_vm1, %v2707_v18  ;;  %755 = vst.msk [vmem:[#allocation2 + $0x59] sm:$0x1] %vm741_vm1, %v2707_v18  ;;  %s2986_s15 = scalar_select %p729_p8, 1, 0 }
  0x5b   : > { %2358 = vmatprep.mubr.msk.f32.mxu0 %vm414_vm0, %v393_v10  ;;  %2378 = vmatprep.subr.mxu1 %v405_v1  ;;  %756 = vst.msk [vmem:[#allocation2 + $0x71] sm:$0x1] %vm741_vm1, %v2707_v18  ;;  %757 = vst.msk [vmem:[#allocation2 + $0x89] sm:$0x1] %vm741_vm1, %v2707_v18  ;;  %s2712_s21 = smov 12   ;;  %s2713_s9 = smov 8  }
  0x5c   : > { %2379 = vmatpush3.msra.mxu1 %v405_v1  ;;  %2380 = vmatprep.mubr.msk.f32.mxu1 %vm414_vm0, %v624_v11  ;;  %758 = vst.msk [vmem:[#allocation2 + $0xa1] sm:$0x1] %vm741_vm1, %v2707_v18  ;;  %760 = vst.msk [vmem:[#allocation2 + $0xd1] sm:$0x1] %vm741_vm1, %v2707_v18  ;;  %s731_s16 = scvt.s32.f32 %s2986_s15  ;;  %s2714_s18 = smov 28   ;;  %vm1637_vm3 = vcmask 1043456  }
  0x5d   : > { %761 = vst.msk [vmem:[#allocation2 + $0xe9] sm:$0x1] %vm741_vm1, %v2707_v18  ;;  %s2715_s13 = smov 24   ;;  %p735_p0 = scmp.lt.s32.totalorder %s2685_s30, 1  ;;  %vm1475_vm4 = vcmask 97280   ;;  %vm1458_vm5 = vcmask 64512  }
  0x5e   : > { %2359 = vmatmul.mubr.msk.f32.gmra.mxu0 %vm414_vm0, %v394_v12  ;;  %2381 = vmatmul.mubr.msk.f32.vlgmr.msra.gmra.mxu1 %vm414_vm0, %v625_v13  ;;  %v732_v53 = vstv %s731_s16  ;;  %vm1508_vm6 = vcmask 162816   ;;  %vm1525_vm7 = vcmask 195584   ;;  %vm1542_vm8 = vcmask 228352   ;;  %s2285_s20 = sshll.u32 %s2685_s30, 4  ;;  %s3774_s8 = sld [smem:[#allocation29_spill]] }
  0x5f   : > { %2361 = vmatprep.mubr.msk.f32.mxu0 %vm414_vm0, %v395_v14  ;;  %2383 = vmatprep.mubr.msk.f32.mxu1 %vm414_vm0, %v626_v21  ;;  %s736_s14 = scalar_select %p735_p0, 1, 0  ;;  %vm1559_vm9 = vcmask 261120   ;;  %vm1588_vm10 = vcmask 293888  }
  0x61   : > { %s737_s22 = scvt.s32.f32 %s736_s14 }
  0x62   : > { %2362 = vmatmul.mubr.msk.f32.gmra.mxu0 %vm414_vm0, %v396_v15  ;;  %2384 = vmatmul.mubr.msk.f32.gmra.mxu1 %vm414_vm0, %v627_v22 }
  0x63   : > { %2364 = vmatprep.mubr.msk.f32.mxu0 %vm414_vm0, %v397_v16 }
  0x66   : > { %2365 = vmatmul.mubr.msk.f32.gmra.mxu0 %vm414_vm0, %v398_v17 }
  0x67   : > { %2367 = vmatprep.mubr.msk.f32.mxu0 %vm414_vm0, %v399_v19 }
  0x6a   : > { %2368 = vmatmul.mubr.msk.f32.gmra.mxu0 %vm414_vm0, %v400_v20 }
 0x116   : > { %v2354_v24 = vpop.f32.mrf.mxu0  ;;  %v2372_v25 = vpop.f32.mrf.mxu1 }
 0x117   : > { %v535_v26 = vadd.f32 %v2354_v24, %v2981_v23  ;;  %v595_v27 = vadd.f32 %v2372_v25, %v2981_v23 }
 0x118   : > { %v529_v28 = vpop.f32.mrf.mxu0  ;;  %v589_v29 = vpop.f32.mrf.mxu1 }
 0x119   : > { %v609_v30 = vmax.f32 %v535_v26, 0.0  ;;  %v621_v31 = vmax.f32 %v595_v27, 0.0  ;;  %v530_v32 = vadd.f32 %v2981_v23, %v529_v28  ;;  %v590_v33 = vadd.f32 %v2981_v23, %v589_v29 }
 0x11a   : > { %v2357_v34 = vpop.f32.mrf.mxu0  ;;  %v2375_v35 = vpop.f32.mrf.mxu1 }
 0x11b   : > { %765 = vst.msk [vmem:[#allocation2 + $0x21] sm:$0xff] %vm763_vm2, %v609_v30  ;;  %777 = vst.msk [vmem:[#allocation2 + $0xb1] sm:$0xff] %vm763_vm2, %v621_v31  ;;  %v608_v36 = vmax.f32 %v530_v32, 0.0  ;;  %v620_v37 = vmax.f32 %v590_v33, 0.0  ;;  %v545_v38 = vadd.f32 %v2357_v34, %v2981_v23  ;;  %v605_v39 = vadd.f32 %v2375_v35, %v2981_v23 }
 0x11c   : > { %v539_v40 = vpop.f32.mrf.mxu0  ;;  %v599_v41 = vpop.f32.mrf.mxu1 }
 0x11d   : > { %764 = vst.msk [vmem:[#allocation2 + $0x19] sm:$0xff] %vm763_vm2, %v608_v36  ;;  %776 = vst.msk [vmem:[#allocation2 + $0xa9] sm:$0xff] %vm763_vm2, %v620_v37  ;;  %v611_v42 = vmax.f32 %v545_v38, 0.0  ;;  %v540_v43 = vadd.f32 %v2981_v23, %v539_v40  ;;  %v623_v44 = vmax.f32 %v605_v39, 0.0  ;;  %v600_v45 = vadd.f32 %v2981_v23, %v599_v41 }
 0x11e   : > { %v2360_v46 = vpop.f32.mrf.mxu0  ;;  %v2382_v47 = vpop.f32.mrf.mxu1 }
 0x11f   : > { %767 = vst.msk [vmem:[#allocation2 + $0x39] sm:$0xff] %vm763_vm2, %v611_v42  ;;  %v610_v48 = vmax.f32 %v540_v43, 0.0  ;;  %779 = vst.msk [vmem:[#allocation2 + $0xc9] sm:$0xff] %vm763_vm2, %v623_v44  ;;  %v622_v49 = vmax.f32 %v600_v45, 0.0  ;;  %v555_v50 = vadd.f32 %v2360_v46, %v2981_v23  ;;  %v712_v51 = vadd.f32 %v2382_v47, %v2981_v23 }
 0x120   : > { %v549_v52 = vpop.f32.mrf.mxu0  ;;  %v706_v54 = vpop.f32.mrf.mxu1  ;;  %v738_v47 = vstv %s737_s22 }
 0x121   : > { %766 = vst.msk [vmem:[#allocation2 + $0x31] sm:$0xff] %vm763_vm2, %v610_v48  ;;  %778 = vst.msk [vmem:[#allocation2 + $0xc1] sm:$0xff] %vm763_vm2, %v622_v49  ;;  %v613_v55 = vmax.f32 %v555_v50, 0.0  ;;  %v550_v56 = vadd.f32 %v2981_v23, %v549_v52  ;;  %v726_v57 = vmax.f32 %v712_v51, 0.0  ;;  %v707_v58 = vadd.f32 %v2981_v23, %v706_v54 }
 0x122   : > { %v862_v59 = vld [vmem:[#allocation2 + $0xb1] sm:$0xff]  ;;  %v850_v60 = vld [vmem:[#allocation2 + $0x21] sm:$0xff]  ;;  %v2363_v0 = vpop.f32.mrf.mxu0  ;;  %v2385_v41 = vpop.f32.mrf.mxu1 }
 0x123   : > { %1164 = vrot.lane.b32.xlu1 %v862_v59, %s2708_s26  ;;  %1140 = vrot.lane.b32.xlu0 %v850_v60, %s2708_s26  ;;  %769 = vst.msk [vmem:[#allocation2 + $0x51] sm:$0xff] %vm763_vm2, %v613_v55  ;;  %v612_v61 = vmax.f32 %v550_v56, 0.0  ;;  %v734_v62 = vmul.f32 %v732_v53, %v726_v57  ;;  %v725_v63 = vmax.f32 %v707_v58, 0.0  ;;  %v565_v1 = vadd.f32 %v2363_v0, %v2981_v23  ;;  %v925_v4 = vld [vmem:[#allocation2 + $0xb2] sm:$0xff]  ;;  %v866_v8 = vld [vmem:[#allocation2 + $0x22] sm:$0xff] }
 0x124   : > { %v559_v3 = vpop.f32.mrf.mxu0  ;;  %v3018_v9 = vld [vmem:[#allocation2 + $0x20] sm:$0xff]  ;;  %v3030_v12 = vld [vmem:[#allocation2 + $0xa8] sm:$0xff]  ;;  %v3038_v13 = vld [vmem:[#allocation2 + $0x18] sm:$0xff]  ;;  %v722_v42 = vadd.f32 %v2385_v41, %v2981_v23  ;;  %v716_v43 = vpop.f32.mrf.mxu1 }
 0x125   : > { %768 = vst.msk [vmem:[#allocation2 + $0x49] sm:$0xff] %vm763_vm2, %v612_v61  ;;  %781 = vst.msk [vmem:[#allocation2 + $0x9] sm:$0xff] %vm763_vm2, %v734_v62  ;;  %v733_v2 = vmul.f32 %v732_v53, %v725_v63  ;;  %v615_v5 = vmax.f32 %v565_v1, 0.0  ;;  %v560_v6 = vadd.f32 %v2981_v23, %v559_v3  ;;  %v803_v10 = vld [vmem:[#allocation2 + $0x19] sm:$0xff]  ;;  %v908_v14 = vld [vmem:[#allocation2 + $0xa9] sm:$0xff]  ;;  %v717_v45 = vadd.f32 %v2981_v23, %v716_v43 }
 0x126   : > { %v865_v11 = vld [vmem:[#allocation2 + $0x1a] sm:$0xff]  ;;  %v2366_v15 = vpop.f32.mrf.mxu0  ;;  %v3048_v21 = vld [vmem:[#allocation2 + $0xb0] sm:$0xff]  ;;  %v728_v44 = vmax.f32 %v722_v42, 0.0 }
 0x127   : > { %1416 = vrot.lane.b32.xlu1 %v925_v4, %s2709_s17  ;;  %952 = vrot.lane.b32.xlu0 %v850_v60, %s2710_s0  ;;  %780 = vst.msk [vmem:[#allocation2 + $0x1] sm:$0xff] %vm763_vm2, %v733_v2  ;;  %771 = vst.msk [vmem:[#allocation2 + $0x69] sm:$0xff] %vm763_vm2, %v615_v5  ;;  %v614_v7 = vmax.f32 %v560_v6, 0.0  ;;  %v575_v16 = vadd.f32 %v2366_v15, %v2981_v23  ;;  %v924_v22 = vld [vmem:[#allocation2 + $0xaa] sm:$0xff]  ;;  %v852_v24 = vld [vmem:[#allocation2 + $0x39] sm:$0xff]  ;;  %v727_v48 = vmax.f32 %v717_v45, 0.0 }
 0x128   : > { %v569_v18 = vpop.f32.mrf.mxu0  ;;  %v915_v25 = vld [vmem:[#allocation2 + $0x3a] sm:$0xff]  ;;  %v3061_v26 = vld [vmem:[#allocation2 + $0x30] sm:$0xff]  ;;  %v895_v39 = vld [vmem:[#allocation2 + $0xc8] sm:$0xff]  ;;  %v740_v49 = vmul.f32 %v738_v47, %v728_v44 }
 0x129   : > { %770 = vst.msk [vmem:[#allocation2 + $0x61] sm:$0xff] %vm763_vm2, %v614_v7  ;;  %v617_v17 = vmax.f32 %v575_v16, 0.0  ;;  %v570_v19 = vadd.f32 %v2981_v23, %v569_v18  ;;  %v898_v27 = vld [vmem:[#allocation2 + $0x31] sm:$0xff]  ;;  %v911_v33 = vld [vmem:[#allocation2 + $0xc9] sm:$0xff]  ;;  %v894_v37 = vld [vmem:[#allocation2 + $0xc0] sm:$0xff]  ;;  %v739_v50 = vmul.f32 %v738_v47, %v727_v48 }
 0x12a   : > { %v2369_v28 = vpop.f32.mrf.mxu0  ;;  %v914_v35 = vld [vmem:[#allocation2 + $0x32] sm:$0xff]  ;;  %v910_v38 = vld [vmem:[#allocation2 + $0xc1] sm:$0xff]  ;;  %784 = vst.msk [vmem:[#allocation2 + $0xe1] sm:$0xff] %vm763_vm2, %v740_v49 }
 0x12b   : > { %1204 = vrot.lane.b32.xlu0 %v866_v8, %s2711_s24  ;;  %1076 = vrot.lane.b32.xlu1 %v3018_v9, %s2712_s21  ;;  %773 = vst.msk [vmem:[#allocation2 + $0x81] sm:$0xff] %vm763_vm2, %v617_v17  ;;  %v616_v20 = vmax.f32 %v570_v19, 0.0  ;;  %v585_v29 = vadd.f32 %v2369_v28, %v2981_v23  ;;  %v3081_v36 = vld [vmem:[#allocation2 + $0x38] sm:$0xff]  ;;  %v926_v40 = vld [vmem:[#allocation2 + $0xc2] sm:$0xff]  ;;  %783 = vst.msk [vmem:[#allocation2 + $0xd9] sm:$0xff] %vm763_vm2, %v739_v50 }
 0x12c   : > { %v579_v30 = vpop.f32.mrf.mxu0  ;;  %v901_v46 = vld [vmem:[#allocation2 + $0x51] sm:$0xff]  ;;  %v3112_v54 = vld [vmem:[#allocation2 + $0x48] sm:$0xff]  ;;  %v1580_v62 = vld [vmem:[%s3722_s4 + $0x20] sm:$0xf] }
 0x12d   : > { %772 = vst.msk [vmem:[#allocation2 + $0x79] sm:$0xff] %vm763_vm2, %v616_v20  ;;  %v619_v31 = vmax.f32 %v585_v29, 0.0  ;;  %v580_v32 = vadd.f32 %v2981_v23, %v579_v30  ;;  %v917_v51 = vld [vmem:[#allocation2 + $0x52] sm:$0xff]  ;;  %v818_v52 = vld [vmem:[#allocation2 + $0xa] sm:$0xff]  ;;  %2386 = vmatprep.subr.msk.mxu1 %vm1637_vm3, %v1580_v62 }
 0x12e   : > { %v802_v57 = vld [vmem:[#allocation2 + $0x9] sm:$0xff]  ;;  %2387 = vmatpush3.msk.msra.mxu1 %vm1637_vm3, %v1580_v62  ;;  %v1579_v1 = vld [vmem:[%s3722_s4 + $0x18] sm:$0xff]  ;;  %v801_v15 = vld [vmem:[#allocation2 + $0x1] sm:$0xff] }
 0x12f   : > { %1016 = vrot.lane.b32.xlu0 %v866_v8, %s2713_s9  ;;  %950 = vrot.lane.b32.xlu1 %v803_v10, %s2710_s0  ;;  %775 = vst.msk [vmem:[#allocation2 + $0x99] sm:$0xff] %vm763_vm2, %v619_v31  ;;  %v618_v34 = vmax.f32 %v580_v32, 0.0  ;;  %v3128_v60 = vld [vmem:[#allocation2 + $0x50] sm:$0xff]  ;;  %v1577_v6 = vld [vmem:[%s3722_s4 + $0x8] sm:$0xff] }
 0x130   : > { %v900_v61 = vld [vmem:[#allocation2 + $0x49] sm:$0xff]  ;;  %2388 = vmatprep.subr.mxu1 %v1579_v1  ;;  %v3191_v28 = vld [vmem:[#allocation2 + $0x60] sm:$0xff] }
 0x131   : > { %774 = vst.msk [vmem:[#allocation2 + $0x91] sm:$0xff] %vm763_vm2, %v618_v34  ;;  %2389 = vmatpush3.msra.mxu1 %v1579_v1  ;;  %v1578_v5 = vld [vmem:[%s3722_s4 + $0x10] sm:$0xff]  ;;  %v817_v16 = vld [vmem:[#allocation2 + $0x2] sm:$0xff] }
 0x132   : > { %2390 = vmatprep.subr.mxu1 %v1578_v5  ;;  %v903_v17 = vld [vmem:[#allocation2 + $0x69] sm:$0xff]  ;;  %v902_v34 = vld [vmem:[#allocation2 + $0x61] sm:$0xff] }
 0x133   : > { %1352 = vrot.lane.b32.xlu0 %v862_v59, %s2714_s18  ;;  %1202 = vrot.lane.b32.xlu1 %v865_v11, %s2711_s24  ;;  %v905_v43 = vld [vmem:[#allocation2 + $0x81] sm:$0xff] }
 0x134   : > { %2391 = vmatpush3.msra.mxu1 %v1578_v5  ;;  %v921_v48 = vld [vmem:[#allocation2 + $0x82] sm:$0xff] }
 0x135   : > { %2392 = vmatprep.subr.mxu1 %v1577_v6 }
 0x136   : > { %2393 = vmatpush3.msra.mxu1 %v1577_v6  ;;  %v3263_v6 = vld [vmem:[#allocation2 + $0x80] sm:$0xff] }
 0x137   : > { %976 = vrot.lane.b32.xlu0 %v862_v59, %s2710_s0  ;;  %1014 = vrot.lane.b32.xlu1 %v865_v11, %s2713_s9 }
 0x13b   : > { %1228 = vrot.lane.b32.xlu0 %v925_v4, %s2711_s24  ;;  %1286 = vrot.lane.b32.xlu1 %v3030_v12, %s2715_s13 }
 0x13f   : > { %1040 = vrot.lane.b32.xlu0 %v925_v4, %s2713_s9  ;;  %1098 = vrot.lane.b32.xlu1 %v3030_v12, %s2712_s21  ;;  %v916_v4 = vld [vmem:[#allocation2 + $0x4a] sm:$0xff] }
 0x143   : > { %1074 = vrot.lane.b32.xlu0 %v3038_v13, %s2712_s21  ;;  %1350 = vrot.lane.b32.xlu1 %v908_v14, %s2714_s18 }
 0x147   : > { %1138 = vrot.lane.b32.xlu0 %v803_v10, %s2708_s26  ;;  %1162 = vrot.lane.b32.xlu1 %v908_v14, %s2708_s26  ;;  %v1576_v10 = vld [vmem:[%s3722_s4] sm:$0xff] }
 0x148   : > { %2394 = vmatprep.subr.mxu1 %v1576_v10 }
 0x149   : > { %2395 = vmatpush3.msra.mxu1 %v1576_v10 }
 0x14b   : > { %1288 = vrot.lane.b32.xlu0 %v3048_v21, %s2715_s13  ;;  %1414 = vrot.lane.b32.xlu1 %v924_v22, %s2709_s17 }
 0x14f   : > { %1100 = vrot.lane.b32.xlu0 %v3048_v21, %s2712_s21  ;;  %1038 = vrot.lane.b32.xlu1 %v924_v22, %s2713_s9 }
 0x153   : > { %974 = vrot.lane.b32.xlu0 %v908_v14, %s2710_s0  ;;  %1144 = vrot.lane.b32.xlu1 %v852_v24, %s2708_s26 }
 0x157   : > { %1226 = vrot.lane.b32.xlu0 %v924_v22, %s2711_s24  ;;  %1396 = vrot.lane.b32.xlu1 %v915_v25, %s2709_s17 }
 0x15b   : > { %1332 = vrot.lane.b32.xlu0 %v852_v24, %s2714_s18  ;;  %1266 = vrot.lane.b32.xlu1 %v3061_v26, %s2715_s13 }
 0x15f   : > { %956 = vrot.lane.b32.xlu0 %v852_v24, %s2710_s0  ;;  %1078 = vrot.lane.b32.xlu1 %v3061_v26, %s2712_s21  ;;  %v919_v24 = vld [vmem:[#allocation2 + $0x6a] sm:$0xff] }
 0x163   : > { %1208 = vrot.lane.b32.xlu0 %v915_v25, %s2711_s24  ;;  %1330 = vrot.lane.b32.xlu1 %v898_v27, %s2714_s18 }
 0x167   : > { %1020 = vrot.lane.b32.xlu0 %v915_v25, %s2713_s9  ;;  %1142 = vrot.lane.b32.xlu1 %v898_v27, %s2708_s26 }
 0x16b   : > { %1356 = vrot.lane.b32.xlu0 %v911_v33, %s2714_s18  ;;  %1394 = vrot.lane.b32.xlu1 %v914_v35, %s2709_s17 }
 0x16f   : > { %1168 = vrot.lane.b32.xlu0 %v911_v33, %s2708_s26  ;;  %1018 = vrot.lane.b32.xlu1 %v914_v35, %s2713_s9  ;;  %v3207_v33 = vld [vmem:[#allocation2 + $0x68] sm:$0xff] }
 0x173   : > { %1268 = vrot.lane.b32.xlu0 %v3081_v36, %s2715_s13  ;;  %1290 = vrot.lane.b32.xlu1 %v894_v37, %s2715_s13 }
 0x177   : > { %1080 = vrot.lane.b32.xlu0 %v3081_v36, %s2712_s21  ;;  %1102 = vrot.lane.b32.xlu1 %v894_v37, %s2712_s21 }
 0x17b   : > { %954 = vrot.lane.b32.xlu0 %v898_v27, %s2710_s0  ;;  %1354 = vrot.lane.b32.xlu1 %v910_v38, %s2714_s18 }
 0x17f   : > { %1206 = vrot.lane.b32.xlu0 %v914_v35, %s2711_s24  ;;  %1166 = vrot.lane.b32.xlu1 %v910_v38, %s2708_s26 }
 0x183   : > { %1292 = vrot.lane.b32.xlu0 %v895_v39, %s2715_s13  ;;  %1418 = vrot.lane.b32.xlu1 %v926_v40, %s2709_s17 }
 0x187   : > { %1104 = vrot.lane.b32.xlu0 %v895_v39, %s2712_s21  ;;  %1230 = vrot.lane.b32.xlu1 %v926_v40, %s2711_s24  ;;  %v918_v40 = vld [vmem:[#allocation2 + $0x62] sm:$0xff] }
 0x18b   : > { %1336 = vrot.lane.b32.xlu0 %v901_v46, %s2714_s18  ;;  %1148 = vrot.lane.b32.xlu1 %v901_v46, %s2708_s26 }
 0x18f   : > { %960 = vrot.lane.b32.xlu0 %v901_v46, %s2710_s0  ;;  %1400 = vrot.lane.b32.xlu1 %v917_v51, %s2709_s17 }
 0x193   : > { %1212 = vrot.lane.b32.xlu0 %v917_v51, %s2711_s24  ;;  %1012 = vrot.lane.b32.xlu1 %v818_v52, %s2713_s9 }
 0x195   : > { %v3108_v23 = vpop.permute.xlu1 %1164  ;;  %v3110_v53 = vpop.permute.xlu0 %1140 }
 0x197   : > { %1024 = vrot.lane.b32.xlu0 %v917_v51, %s2713_s9  ;;  %1270 = vrot.lane.b32.xlu1 %v3112_v54, %s2715_s13 }
 0x199   : > { %v3117_v55 = vpop.permute.xlu1 %1416  ;;  %v3119_v56 = vpop.permute.xlu0 %952 }
 0x19a   : > { %3756 = vst [vmem:[#allocation20_spill] sm:$0xff] %v3117_v55 }
 0x19b   : > { %948 = vrot.lane.b32.xlu0 %v802_v57, %s2710_s0  ;;  %1082 = vrot.lane.b32.xlu1 %v3112_v54, %s2712_s21 }
 0x19d   : > { %v3124_v58 = vpop.permute.xlu0 %1204  ;;  %v3126_v59 = vpop.permute.xlu1 %1076 }
 0x19f   : > { %1272 = vrot.lane.b32.xlu0 %v3128_v60, %s2715_s13  ;;  %1334 = vrot.lane.b32.xlu1 %v900_v61, %s2714_s18 }
 0x1a1   : > { %v3137_v63 = vpop.permute.xlu0 %1016  ;;  %v3139_v0 = vpop.permute.xlu1 %950 }
 0x1a2   : > { %v1444_v49 = vsel %vm763_vm2, %v3038_v13, %v3139_v0  ;;  %v3251_v13 = vld [vmem:[#allocation2 + $0x78] sm:$0xff] }
 0x1a3   : > { %1084 = vrot.lane.b32.xlu0 %v3128_v60, %s2712_s21  ;;  %1146 = vrot.lane.b32.xlu1 %v900_v61, %s2708_s26 }
 0x1a5   : > { %v3148_v2 = vpop.permute.xlu0 %1352  ;;  %v3150_v3 = vpop.permute.xlu1 %1202 }
 0x1a7   : > { %958 = vrot.lane.b32.xlu0 %v900_v61, %s2710_s0  ;;  %1398 = vrot.lane.b32.xlu1 %v916_v4, %s2709_s17 }
 0x1a9   : > { %v3160_v7 = vpop.permute.xlu0 %976  ;;  %v3162_v8 = vpop.permute.xlu1 %1014 }
 0x1aa   : > { %v1461_v50 = vsel %vm1458_vm5, %v1444_v49, %v3162_v8  ;;  %v904_v8 = vld [vmem:[#allocation2 + $0x79] sm:$0xff] }
 0x1ab   : > { %1210 = vrot.lane.b32.xlu0 %v916_v4, %s2711_s24  ;;  %1022 = vrot.lane.b32.xlu1 %v916_v4, %s2713_s9  ;;  %v907_v49 = vld [vmem:[#allocation2 + $0x99] sm:$0xff] }
 0x1ad   : > { %v3169_v11 = vpop.permute.xlu0 %1228  ;;  %v3171_v14 = vpop.permute.xlu1 %1286 }
 0x1af   : > { %946 = vrot.lane.b32.xlu0 %v801_v15, %s2710_s0  ;;  %1010 = vrot.lane.b32.xlu1 %v817_v16, %s2713_s9 }
 0x1b1   : > { %v3175_v18 = vpop.permute.xlu0 %1040  ;;  %v3177_v19 = vpop.permute.xlu1 %1098 }
 0x1b3   : > { %1340 = vrot.lane.b32.xlu0 %v903_v17, %s2714_s18  ;;  %1152 = vrot.lane.b32.xlu1 %v903_v17, %s2708_s26 }
 0x1b5   : > { %v3181_v20 = vpop.permute.xlu0 %1074  ;;  %v3183_v22 = vpop.permute.xlu1 %1350 }
 0x1b7   : > { %964 = vrot.lane.b32.xlu0 %v903_v17, %s2710_s0  ;;  %1404 = vrot.lane.b32.xlu1 %v919_v24, %s2709_s17 }
 0x1b9   : > { %v3187_v25 = vpop.permute.xlu0 %1138  ;;  %v3189_v27 = vpop.permute.xlu1 %1162 }
 0x1bb   : > { %1216 = vrot.lane.b32.xlu0 %v919_v24, %s2711_s24  ;;  %1274 = vrot.lane.b32.xlu1 %v3191_v28, %s2715_s13 }
 0x1bd   : > { %v3196_v29 = vpop.permute.xlu0 %1288  ;;  %v3198_v30 = vpop.permute.xlu1 %1414 }
 0x1bf   : > { %1028 = vrot.lane.b32.xlu0 %v919_v24, %s2713_s9  ;;  %1086 = vrot.lane.b32.xlu1 %v3191_v28, %s2712_s21  ;;  %v920_v24 = vld [vmem:[#allocation2 + $0x7a] sm:$0xff] }
 0x1c1   : > { %v3203_v31 = vpop.permute.xlu0 %1100  ;;  %v3205_v32 = vpop.permute.xlu1 %1038 }
 0x1c3   : > { %1276 = vrot.lane.b32.xlu0 %v3207_v33, %s2715_s13  ;;  %1338 = vrot.lane.b32.xlu1 %v902_v34, %s2714_s18 }
 0x1c5   : > { %v975_v35 = vpop.permute.xlu0 %974  ;;  %v3212_v37 = vpop.permute.xlu1 %1144 }
 0x1c7   : > { %1088 = vrot.lane.b32.xlu0 %v3207_v33, %s2712_s21  ;;  %1150 = vrot.lane.b32.xlu1 %v902_v34, %s2708_s26 }
 0x1c9   : > { %v3217_v38 = vpop.permute.xlu0 %1226  ;;  %v3219_v39 = vpop.permute.xlu1 %1396 }
 0x1cb   : > { %962 = vrot.lane.b32.xlu0 %v902_v34, %s2710_s0  ;;  %1402 = vrot.lane.b32.xlu1 %v918_v40, %s2709_s17  ;;  %v1456_v34 = vsel %vm763_vm2, %v3030_v12, %v975_v35 }
 0x1cd   : > { %v3223_v41 = vpop.permute.xlu0 %1332  ;;  %v3225_v42 = vpop.permute.xlu1 %1266 }
 0x1cf   : > { %1214 = vrot.lane.b32.xlu0 %v918_v40, %s2711_s24  ;;  %1026 = vrot.lane.b32.xlu1 %v918_v40, %s2713_s9 }
 0x1d1   : > { %v957_v44 = vpop.permute.xlu0 %956  ;;  %v1079_v45 = vpop.permute.xlu1 %1078 }
 0x1d2   : > { %v1447_v51 = vsel %vm763_vm2, %v3081_v36, %v957_v44  ;;  %v1478_v52 = vsel %vm1475_vm4, %v1461_v50, %v1079_v45 }
 0x1d3   : > { %1344 = vrot.lane.b32.xlu0 %v905_v43, %s2714_s18  ;;  %1156 = vrot.lane.b32.xlu1 %v905_v43, %s2708_s26 }
 0x1d5   : > { %v3231_v46 = vpop.permute.xlu0 %1208  ;;  %v3233_v47 = vpop.permute.xlu1 %1330 }
 0x1d7   : > { %968 = vrot.lane.b32.xlu0 %v905_v43, %s2710_s0  ;;  %1408 = vrot.lane.b32.xlu1 %v921_v48, %s2709_s17 }
 0x1d9   : > { %v1021_v57 = vpop.permute.xlu0 %1020  ;;  %v1143_v61 = vpop.permute.xlu1 %1142 }
 0x1da   : > { %v3246_v62 = vsel %vm1458_vm5, %v1447_v51, %v1021_v57  ;;  %v3249_v1 = vsel %vm414_vm0, %v1478_v52, %v1143_v61  ;;  %v923_v57 = vld [vmem:[#allocation2 + $0x9a] sm:$0xff] }
 0x1db   : > { %1220 = vrot.lane.b32.xlu0 %v921_v48, %s2711_s24  ;;  %1278 = vrot.lane.b32.xlu1 %v3251_v13, %s2715_s13 }
 0x1dd   : > { %v3256_v0 = vpop.permute.xlu0 %1356  ;;  %v3258_v36 = vpop.permute.xlu1 %1394 }
 0x1de   : > { %3757 = vst [vmem:[#allocation21_spill] sm:$0xff] %v3256_v0  ;;  %v897_v0 = vld [vmem:[#allocation2 + $0xe0] sm:$0xff] }
 0x1df   : > { %1032 = vrot.lane.b32.xlu0 %v921_v48, %s2713_s9  ;;  %1090 = vrot.lane.b32.xlu1 %v3251_v13, %s2712_s21  ;;  %v1473_v48 = vsel %vm1458_vm5, %v1456_v34, %v3205_v32  ;;  %v1457_v32 = vsel %vm763_vm2, %v3048_v21, %v3160_v7  ;;  %v3313_v34 = vld [vmem:[#allocation2 + $0x90] sm:$0xff] }
 0x1e0   : > { %v1474_v61 = vsel %vm1458_vm5, %v1457_v32, %v3175_v18 }
 0x1e1   : > { %v1169_v4 = vpop.permute.xlu0 %1168  ;;  %v1019_v5 = vpop.permute.xlu1 %1018 }
 0x1e3   : > { %1280 = vrot.lane.b32.xlu0 %v3263_v6, %s2715_s13  ;;  %1342 = vrot.lane.b32.xlu1 %v904_v8, %s2714_s18 }
 0x1e5   : > { %v3268_v10 = vpop.permute.xlu0 %1268  ;;  %v3270_v15 = vpop.permute.xlu1 %1290 }
 0x1e6   : > { %3758 = vst [vmem:[#allocation22_spill] sm:$0xff] %v3270_v15  ;;  %v912_v15 = vld [vmem:[#allocation2 + $0xd9] sm:$0xff] }
 0x1e7   : > { %1092 = vrot.lane.b32.xlu0 %v3263_v6, %s2712_s21  ;;  %1154 = vrot.lane.b32.xlu1 %v904_v8, %s2708_s26 }
 0x1e9   : > { %v3275_v16 = vpop.permute.xlu0 %1080  ;;  %v1103_v17 = vpop.permute.xlu1 %1102 }
 0x1ea   : > { %v1490_v50 = vsel %vm1475_vm4, %v1473_v48, %v1103_v17  ;;  %v3330_v48 = vld [vmem:[#allocation2 + $0x98] sm:$0xff] }
 0x1eb   : > { %966 = vrot.lane.b32.xlu0 %v904_v8, %s2710_s0  ;;  %1406 = vrot.lane.b32.xlu1 %v920_v24, %s2709_s17 }
 0x1ed   : > { %v955_v40 = vpop.permute.xlu0 %954  ;;  %v3281_v43 = vpop.permute.xlu1 %1354 }
 0x1ee   : > { %3759 = vst [vmem:[#allocation23_spill] sm:$0xff] %v3281_v43  ;;  %v1446_v44 = vsel %vm763_vm2, %v3061_v26, %v955_v40 }
 0x1ef   : > { %1218 = vrot.lane.b32.xlu0 %v920_v24, %s2711_s24  ;;  %1030 = vrot.lane.b32.xlu1 %v920_v24, %s2713_s9  ;;  %v3288_v45 = vsel %vm1458_vm5, %v1446_v44, %v1019_v5 }
 0x1f1   : > { %v3293_v12 = vpop.permute.xlu0 %1206  ;;  %v1167_v35 = vpop.permute.xlu1 %1166 }
 0x1f2   : > { %v1506_v51 = vsel %vm414_vm0, %v1490_v50, %v1167_v35 }
 0x1f3   : > { %1348 = vrot.lane.b32.xlu0 %v907_v49, %s2714_s18  ;;  %1160 = vrot.lane.b32.xlu1 %v907_v49, %s2708_s26 }
 0x1f5   : > { %v3298_v26 = vpop.permute.xlu0 %1292  ;;  %v3300_v52 = vpop.permute.xlu1 %1418 }
 0x1f6   : > { %3760 = vst [vmem:[#allocation24_spill] sm:$0xff] %v3298_v26  ;;  %3761 = vst [vmem:[#allocation25_spill] sm:$0xff] %v3300_v52 }
 0x1f7   : > { %972 = vrot.lane.b32.xlu0 %v907_v49, %s2710_s0  ;;  %1412 = vrot.lane.b32.xlu1 %v923_v57, %s2709_s17  ;;  %v906_v49 = vld [vmem:[#allocation2 + $0x91] sm:$0xff] }
 0x1f9   : > { %v1105_v5 = vpop.permute.xlu0 %1104  ;;  %v1231_v8 = vpop.permute.xlu1 %1230 }
 0x1fa   : > { %v1491_v17 = vsel %vm1475_vm4, %v1474_v61, %v1105_v5  ;;  %v3311_v24 = vsel %vm1508_vm6, %v1506_v51, %v1231_v8  ;;  %v922_v61 = vld [vmem:[#allocation2 + $0x92] sm:$0xff] }
 0x1fb   : > { %3762 = vst [vmem:[#allocation26_spill] sm:$0xff] %v3311_v24  ;;  %1224 = vrot.lane.b32.xlu0 %v923_v57, %s2711_s24  ;;  %1282 = vrot.lane.b32.xlu1 %v3313_v34, %s2715_s13  ;;  %v3319_v21 = vsel %vm414_vm0, %v1491_v17, %v1169_v4 }
 0x1fc   : > { %3763 = vst [vmem:[#allocation27_spill] sm:$0xff] %v3319_v21  ;;  %v896_v21 = vld [vmem:[#allocation2 + $0xd8] sm:$0xff] }
 0x1fd   : > { %v3321_v7 = vpop.permute.xlu0 %1336  ;;  %v3323_v18 = vpop.permute.xlu1 %1148 }
 0x1ff   : > { %1036 = vrot.lane.b32.xlu0 %v923_v57, %s2713_s9  ;;  %1094 = vrot.lane.b32.xlu1 %v3313_v34, %s2712_s21 }
 0x201   : > { %v961_v40 = vpop.permute.xlu0 %960  ;;  %v3328_v44 = vpop.permute.xlu1 %1400 }
 0x202   : > { %v1449_v35 = vsel %vm763_vm2, %v3128_v60, %v961_v40  ;;  %v927_v40 = vld [vmem:[#allocation2 + $0xca] sm:$0xff] }
 0x203   : > { %1284 = vrot.lane.b32.xlu0 %v3330_v48, %s2715_s13  ;;  %1346 = vrot.lane.b32.xlu1 %v906_v49, %s2714_s18 }
 0x205   : > { %v3335_v4 = vpop.permute.xlu0 %1212  ;;  %v1013_v50 = vpop.permute.xlu1 %1012 }
 0x207   : > { %1096 = vrot.lane.b32.xlu0 %v3330_v48, %s2712_s21  ;;  %1158 = vrot.lane.b32.xlu1 %v906_v49, %s2708_s26 }
 0x209   : > { %v1025_v51 = vpop.permute.xlu0 %1024  ;;  %v3342_v57 = vpop.permute.xlu1 %1270 }
 0x20a   : > { %v3345_v32 = vsel %vm1458_vm5, %v1449_v35, %v1025_v51  ;;  %v786_v35 = vld [vmem:[#allocation2 + $0x8] sm:$0xff] }
 0x20b   : > { %970 = vrot.lane.b32.xlu0 %v906_v49, %s2710_s0  ;;  %1410 = vrot.lane.b32.xlu1 %v922_v61, %s2709_s17  ;;  %s2716_s0 = smov [#allocation8]  }
 0x20d   : > { %v949_v5 = vpop.permute.xlu0 %948  ;;  %v3349_v8 = vpop.permute.xlu1 %1082 }
 0x20e   : > { %v1443_v51 = vsel %vm763_vm2, %v786_v35, %v949_v5 }
 0x20f   : > { %1222 = vrot.lane.b32.xlu0 %v922_v61, %s2711_s24  ;;  %1034 = vrot.lane.b32.xlu1 %v922_v61, %s2713_s9  ;;  %v1460_v61 = vsel %vm1458_vm5, %v1443_v51, %v1013_v50  ;;  %v929_v50 = vld [vmem:[#allocation2 + $0xe2] sm:$0xff]  ;;  %v1445_v51 = vsel %vm763_vm2, %v3018_v9, %v3119_v56 }
 0x210   : > { %v1477_v5 = vsel %vm1475_vm4, %v1460_v61, %v3126_v59  ;;  %v1462_v59 = vsel %vm1458_vm5, %v1445_v51, %v3137_v63 }
 0x211   : > { %v1273_v17 = vpop.permute.xlu0 %1272  ;;  %v1335_v60 = vpop.permute.xlu1 %1334 }
 0x213   : > { %1420 = vrot.lane.b32.xlu0 %v927_v40, %s2709_s17  ;;  %1232 = vrot.lane.b32.xlu1 %v927_v40, %s2711_s24  ;;  %v913_v40 = vld [vmem:[#allocation2 + $0xe1] sm:$0xff]  ;;  %s2605_s24 = sshll.u32 %s2716_s0, 4  ;;  %s2606_s24 = int_to_ptr.vmem [resolvable:$false] %s2605_s24 }
 0x214   : > { %s2607_s21 = scalar_lea.vmem %s2606_s24, 4096 }
 0x215   : > { %v3356_v49 = vpop.permute.xlu0 %1084  ;;  %v3358_v24 = vpop.permute.xlu1 %1146 }
 0x217   : > { %1294 = vrot.lane.b32.xlu0 %v896_v21, %s2715_s13  ;;  %1296 = vrot.lane.b32.xlu1 %v897_v0, %s2715_s13  ;;  %v1493_v0 = vsel %vm414_vm0, %v1477_v5, %v3110_v53  ;;  %v928_v21 = vld [vmem:[#allocation2 + $0xda] sm:$0xff]  ;;  %s3597_s13 = scalar_lea.vmem [#allocation8], %s2217_s19  ;;  %s3772_s19 = sld [smem:[#allocation14_spill]] }
 0x218   : > { %v1510_v61 = vsel %vm1508_vm6, %v1493_v0, %v3124_v58  ;;  %v785_v53 = vld [vmem:[#allocation2] sm:$0xff]  ;;  %s2087_s14 = sshll.u32 %s3597_s13, 4  ;;  %s3662_s14 = int_to_ptr.vmem [resolvable:$true] %s2087_s14 }
 0x219   : > { %v3363_v52 = vpop.permute.xlu0 %958  ;;  %v1399_v43 = vpop.permute.xlu1 %1398  ;;  %p2608_p4 = scmp.lt.s32.totalorder %s3662_s14, %s2606_s24 }
 0x21b   : > { %1358 = vrot.lane.b32.xlu0 %v912_v15, %s2714_s18  ;;  %1360 = vrot.lane.b32.xlu1 %v913_v40, %s2714_s18  ;;  %v1479_v15 = vsel %vm1475_vm4, %v1462_v59, %v3275_v16  ;;  %v1527_v16 = vsel %vm1525_vm7, %v1510_v61, %v3268_v10 }
 0x21c   : > { %v1495_v56 = vsel %vm414_vm0, %v1479_v15, %v3212_v37 }
 0x21d   : > { %v3369_v35 = vpop.permute.xlu0 %1210  ;;  %v3371_v55 = vpop.permute.xlu1 %1022  ;;  %s2280_s27 = sshll.u32 %s3772_s19, 5 }
 0x21e   : > { %s2084_s15 = sadd.s32 %s2285_s20, %s2280_s27 }
 0x21f   : > { %1422 = vrot.lane.b32.xlu0 %v928_v21, %s2709_s17  ;;  %1424 = vrot.lane.b32.xlu1 %v929_v50, %s2709_s17  ;;  %s2281_s30 = sshll.u32 %s2084_s15, 7  ;;  %s2601_s17 = scalar_lea.vmem %s3662_s14, 2048 }
 0x220   : > { %s3658_s26 = scalar_lea.hbm %s3774_s8, %s2281_s30  ;;  %p2602_p1 = scmp.ne.s32.totalorder %s3662_s14, %s2601_s17 }
 0x221   : > { %v947_v40 = vpop.permute.xlu0 %946  ;;  %v1011_v5 = vpop.permute.xlu1 %1010  ;;  %p2609_p5 = scmp.lt.s32.totalorder %s2607_s21, %s2601_s17 }
 0x222   : > { %v1442_v26 = vsel %vm763_vm2, %v785_v53, %v947_v40  ;;  %p2603_p13 = pnand %p2602_p1, %p2828_p9 }
 0x223   : > { %v1459_v9 = vsel %vm1458_vm5, %v1442_v26, %v1011_v5  ;;  %v1512_v26 = vsel %vm1508_vm6, %v1495_v56, %v3231_v46  ;;  %p2610_p3 = por %p2609_p5, %p2608_p4 }
 0x224   : > { %v1476_v63 = vsel %vm1475_vm4, %v1459_v9, %v3181_v20  ;;  %v1544_v20 = vsel %vm1542_vm8, %v1527_v16, %v3223_v41  ;;  %v1529_v10 = vsel %vm1525_vm7, %v1512_v26, %v1273_v17  ;;  %p2604_p2 = pneg %p2603_p13 }
 0x225   : > { %v1492_v58 = vsel %vm414_vm0, %v1476_v63, %v3187_v25  ;;  %v1341_v0 = vpop.permute.xlu0 %1340  ;;  %v1153_v21 = vpop.permute.xlu1 %1152  ;;  %v1511_v25 = vsel %vm1508_vm6, %v3249_v1, %v3293_v12  ;;  %v1561_v41 = vsel %vm1559_vm9, %v1544_v20, %v3219_v39  ;;  %v1546_v1 = vsel %vm1542_vm8, %v1529_v10, %v3321_v7 }
 0x226   : > { %v1509_v50 = vsel %vm1508_vm6, %v1492_v58, %v3150_v3  ;;  %v1528_v3 = vsel %vm1525_vm7, %v1511_v25, %v3342_v57  ;;  %p2611_p6 = pnand %p2610_p3, %p2604_p2 }
 0x227   : > { %v1526_v37 = vsel %vm1525_vm7, %v1509_v50, %v3225_v42  ;;  %v1545_v15 = vsel %vm1542_vm8, %v1528_v3, %v1335_v60 }
 0x228   : > { %v1543_v51 = vsel %vm1542_vm8, %v1526_v37, %v3233_v47  ;;  %v1562_v47 = vsel %vm1559_vm9, %v1545_v15, %v1399_v43  ;;  %v1481_v43 = vsel %vm1475_vm4, %v3246_v62, %v3356_v49 }
 0x229   : > { %v965_v46 = vpop.permute.xlu0 %964  ;;  %v1405_v59 = vpop.permute.xlu1 %1404  ;;  %v1560_v42 = vsel %vm1559_vm9, %v1543_v51, %v3258_v36  ;;  %v1563_v36 = vsel %vm1559_vm9, %v1546_v1, %v3328_v44  ;;  %v1497_v61 = vsel %vm414_vm0, %v1481_v43, %v3323_v18 }
 0x22a   : > { %2396 = vmatprep.mubr.msk.f32.mxu1 %vm1588_vm10, %v1560_v42  ;;  %v1451_v17 = vsel %vm763_vm2, %v3207_v33, %v965_v46  ;;  %v1514_v44 = vsel %vm1508_vm6, %v1497_v61, %v3335_v4  ;;  %v1480_v33 = vsel %vm1475_vm4, %v3288_v45, %v3349_v8 }
 0x22b   : > { %2397 = vmatmul.mubr.msk.f32.vlgmr.msra.gmra.mxu1 %vm1588_vm10, %v1561_v41  ;;  %v1496_v62 = vsel %vm414_vm0, %v1480_v33, %v3358_v24 }
 0x22c   : > { %2399 = vmatprep.mubr.msk.f32.mxu1 %vm1588_vm10, %v1562_v47  ;;  %v1513_v49 = vsel %vm1508_vm6, %v1496_v62, %v3369_v35 }
 0x22d   : > { %v1217_v12 = vpop.permute.xlu0 %1216  ;;  %v1275_v57 = vpop.permute.xlu1 %1274 }
 0x22e   : > { %v1530_v18 = vsel %vm1525_vm7, %v1513_v49, %v1275_v57 }
 0x22f   : > { %2400 = vmatmul.mubr.msk.f32.gmra.mxu1 %vm1588_vm10, %v1563_v36 }
 0x231   : > { %v1029_v39 = vpop.permute.xlu0 %1028  ;;  %v1087_v60 = vpop.permute.xlu1 %1086 }
 0x232   : > { %v3432_v7 = vsel %vm1458_vm5, %v1451_v17, %v1029_v39 }
 0x235   : > { %v1277_v53 = vpop.permute.xlu0 %1276  ;;  %v1339_v40 = vpop.permute.xlu1 %1338 }
 0x236   : > { %v1531_v5 = vsel %vm1525_vm7, %v1514_v44, %v1277_v53  ;;  %v1547_v4 = vsel %vm1542_vm8, %v1530_v18, %v1339_v40 }
 0x237   : > { %v1548_v63 = vsel %vm1542_vm8, %v1531_v5, %v1341_v0 }
 0x238   : > { %v1565_v8 = vsel %vm1559_vm9, %v1548_v63, %v1405_v59  ;;  %v1448_v59 = vsel %vm763_vm2, %v3112_v54, %v3363_v52  ;;  %v1802_v63 = vld [vmem:[%s3724_s6] sm:$0xf] }
 0x239   : > { %v1089_v9 = vpop.permute.xlu0 %1088  ;;  %v1151_v56 = vpop.permute.xlu1 %1150  ;;  %v1465_v41 = vsel %vm1458_vm5, %v1448_v59, %v3371_v55  ;;  %2420 = vmatprep.subr.msk.mxu0 %vm1637_vm3, %v1802_v63 }
 0x23a   : > { %v1483_v3 = vsel %vm1475_vm4, %v3345_v32, %v1089_v9  ;;  %v1482_v47 = vsel %vm1475_vm4, %v1465_v41, %v1087_v60  ;;  %2421 = vmatpush3.msk.msra.mxu0 %vm1637_vm3, %v1802_v63 }
 0x23b   : > { %v1499_v46 = vsel %vm414_vm0, %v1483_v3, %v1153_v21  ;;  %v1498_v32 = vsel %vm414_vm0, %v1482_v47, %v1151_v56 }
 0x23c   : > { %v1516_v1 = vsel %vm1508_vm6, %v1499_v46, %v1217_v12 }
 0x23d   : > { %v963_v16 = vpop.permute.xlu0 %962  ;;  %v1403_v58 = vpop.permute.xlu1 %1402 }
 0x23e   : > { %v1564_v45 = vsel %vm1559_vm9, %v1547_v4, %v1403_v58 }
 0x23f   : > { %2402 = vmatprep.mubr.msk.f32.mxu1 %vm1588_vm10, %v1564_v45 }
 0x240   : > { %2403 = vmatmul.mubr.msk.f32.gmra.mxu1 %vm1588_vm10, %v1565_v8  ;;  %v1450_v8 = vsel %vm763_vm2, %v3191_v28, %v963_v16 }
 0x241   : > { %v1215_v24 = vpop.permute.xlu0 %1214  ;;  %v1027_v50 = vpop.permute.xlu1 %1026 }
 0x242   : > { %v1515_v21 = vsel %vm1508_vm6, %v1498_v32, %v1215_v24  ;;  %v1467_v24 = vsel %vm1458_vm5, %v1450_v8, %v1027_v50  ;;  %v3771_v8 = vld [vmem:[#allocation26_spill] sm:$0xff] }
 0x245   : > { %v1345_v26 = vpop.permute.xlu0 %1344  ;;  %v1157_v35 = vpop.permute.xlu1 %1156 }
 0x249   : > { %v969_v37 = vpop.permute.xlu0 %968  ;;  %v1409_v20 = vpop.permute.xlu1 %1408 }
 0x24d   : > { %v1221_v25 = vpop.permute.xlu0 %1220  ;;  %v1279_v0 = vpop.permute.xlu1 %1278 }
 0x24e   : > { %v1532_v39 = vsel %vm1525_vm7, %v1515_v21, %v1279_v0 }
 0x251   : > { %v1033_v10 = vpop.permute.xlu0 %1032  ;;  %v1091_v51 = vpop.permute.xlu1 %1090 }
 0x252   : > { %v1484_v0 = vsel %vm1475_vm4, %v1467_v24, %v1091_v51 }
 0x255   : > { %v1281_v42 = vpop.permute.xlu0 %1280  ;;  %v1343_v15 = vpop.permute.xlu1 %1342 }
 0x256   : > { %v1533_v57 = vsel %vm1525_vm7, %v1516_v1, %v1281_v42  ;;  %v1549_v54 = vsel %vm1542_vm8, %v1532_v39, %v1343_v15 }
 0x257   : > { %v1550_v43 = vsel %vm1542_vm8, %v1533_v57, %v1345_v26 }
 0x258   : > { %v1567_v60 = vsel %vm1559_vm9, %v1550_v43, %v1409_v20 }
 0x259   : > { %v1093_v36 = vpop.permute.xlu0 %1092  ;;  %v1155_v17 = vpop.permute.xlu1 %1154 }
 0x25a   : > { %v1485_v18 = vsel %vm1475_vm4, %v3432_v7, %v1093_v36  ;;  %v1453_v7 = vsel %vm763_vm2, %v3263_v6, %v969_v37  ;;  %v1500_v28 = vsel %vm414_vm0, %v1484_v0, %v1155_v17 }
 0x25b   : > { %v1501_v4 = vsel %vm414_vm0, %v1485_v18, %v1157_v35  ;;  %v1470_v20 = vsel %vm1458_vm5, %v1453_v7, %v1033_v10 }
 0x25c   : > { %v1518_v26 = vsel %vm1508_vm6, %v1501_v4, %v1221_v25 }
 0x25d   : > { %v967_v52 = vpop.permute.xlu0 %966  ;;  %v1407_v55 = vpop.permute.xlu1 %1406 }
 0x25e   : > { %v1566_v12 = vsel %vm1559_vm9, %v1549_v54, %v1407_v55  ;;  %v1452_v1 = vsel %vm763_vm2, %v3251_v13, %v967_v52 }
 0x25f   : > { %2405 = vmatprep.mubr.msk.f32.mxu1 %vm1588_vm10, %v1566_v12 }
 0x260   : > { %2406 = vmatmul.mubr.msk.f32.gmra.mxu1 %vm1588_vm10, %v1567_v60 }
 0x261   : > { %v1219_v61 = vpop.permute.xlu0 %1218  ;;  %v1031_v53 = vpop.permute.xlu1 %1030 }
 0x262   : > { %v1517_v6 = vsel %vm1508_vm6, %v1500_v28, %v1219_v61  ;;  %v1469_v57 = vsel %vm1458_vm5, %v1452_v1, %v1031_v53 }
 0x265   : > { %v1349_v40 = vpop.permute.xlu0 %1348  ;;  %v1161_v44 = vpop.permute.xlu1 %1160 }
 0x269   : > { %v973_v33 = vpop.permute.xlu0 %972  ;;  %v1413_v5 = vpop.permute.xlu1 %1412 }
 0x26a   : > { %v1455_v3 = vsel %vm763_vm2, %v3330_v48, %v973_v33 }
 0x26d   : > { %v1225_v9 = vpop.permute.xlu0 %1224  ;;  %v1283_v56 = vpop.permute.xlu1 %1282 }
 0x26e   : > { %v1534_v25 = vsel %vm1525_vm7, %v1517_v6, %v1283_v56 }
 0x271   : > { %v1037_v62 = vpop.permute.xlu0 %1036  ;;  %v1095_v49 = vpop.permute.xlu1 %1094 }
 0x272   : > { %v1472_v16 = vsel %vm1458_vm5, %v1455_v3, %v1037_v62  ;;  %v1486_v17 = vsel %vm1475_vm4, %v1469_v57, %v1095_v49 }
 0x273   : > { %v1489_v48 = vsel %vm1475_vm4, %v1472_v16, %v3203_v31 }
 0x274   : > { %v1505_v31 = vsel %vm414_vm0, %v1489_v48, %v3108_v23 }
 0x275   : > { %v1285_v58 = vpop.permute.xlu0 %1284  ;;  %v1347_v45 = vpop.permute.xlu1 %1346 }
 0x276   : > { %v1535_v35 = vsel %vm1525_vm7, %v1518_v26, %v1285_v58  ;;  %v1551_v51 = vsel %vm1542_vm8, %v1534_v25, %v1347_v45  ;;  %v3770_v58 = vld [vmem:[#allocation27_spill] sm:$0xff] }
 0x277   : > { %v1552_v10 = vsel %vm1542_vm8, %v1535_v35, %v1349_v40  ;;  %v3764_v40 = vld [vmem:[#allocation24_spill] sm:$0xff] }
 0x278   : > { %v1569_v36 = vsel %vm1559_vm9, %v1552_v10, %v1413_v5  ;;  %v3768_v5 = vld [vmem:[#allocation25_spill] sm:$0xff] }
 0x279   : > { %v1097_v46 = vpop.permute.xlu0 %1096  ;;  %v1159_v42 = vpop.permute.xlu1 %1158 }
 0x27a   : > { %v1487_v50 = vsel %vm1475_vm4, %v1470_v20, %v1097_v46  ;;  %v1502_v13 = vsel %vm414_vm0, %v1486_v17, %v1159_v42  ;;  %v2241_v42 = vld [vmem:[%s3723_s5] ss:$0 sm:$0xff] }
 0x27b   : > { %v1503_v37 = vsel %vm414_vm0, %v1487_v50, %v1161_v44 }
 0x27c   : > { %v1520_v15 = vsel %vm1508_vm6, %v1503_v37, %v1225_v9 }
 0x27d   : > { %v971_v59 = vpop.permute.xlu0 %970  ;;  %v1411_v41 = vpop.permute.xlu1 %1410  ;;  %v1537_v32 = vsel %vm1525_vm7, %v1520_v15, %v3196_v29  ;;  %v1522_v29 = vsel %vm1508_vm6, %v1505_v31, %v3169_v11 }
 0x27e   : > { %v1568_v47 = vsel %vm1559_vm9, %v1551_v51, %v1411_v41  ;;  %v1454_v21 = vsel %vm763_vm2, %v3313_v34, %v971_v59  ;;  %v1554_v12 = vsel %vm1542_vm8, %v1537_v32, %v3148_v2  ;;  %v1539_v11 = vsel %vm1525_vm7, %v1522_v29, %v3764_v40  ;;  %v3765_v2 = vld [vmem:[#allocation20_spill] sm:$0xff] }
 0x27f   : > { %2408 = vmatprep.mubr.msk.f32.mxu1 %vm1588_vm10, %v1568_v47  ;;  %v1571_v44 = vsel %vm1559_vm9, %v1554_v12, %v3765_v2 }
 0x280   : > { %2409 = vmatmul.mubr.msk.f32.gmra.mxu1 %vm1588_vm10, %v1569_v36 }
 0x281   : > { %v1223_v39 = vpop.permute.xlu0 %1222  ;;  %v1035_v43 = vpop.permute.xlu1 %1034 }
 0x282   : > { %v1519_v54 = vsel %vm1508_vm6, %v1502_v13, %v1223_v39  ;;  %v1471_v52 = vsel %vm1458_vm5, %v1454_v21, %v1035_v43 }
 0x283   : > { %v1536_v23 = vsel %vm1525_vm7, %v1519_v54, %v3171_v14  ;;  %v1488_v55 = vsel %vm1475_vm4, %v1471_v52, %v3177_v19 }
 0x284   : > { %v1504_v34 = vsel %vm414_vm0, %v1488_v55, %v3189_v27  ;;  %v1553_v60 = vsel %vm1542_vm8, %v1536_v23, %v3183_v22  ;;  %v3766_v27 = vld [vmem:[#allocation22_spill] sm:$0xff]  ;;  %v3767_v22 = vld [vmem:[#allocation23_spill] sm:$0xff] }
 0x285   : > { %v1521_v61 = vsel %vm1508_vm6, %v1504_v34, %v3217_v38  ;;  %v1421_v53 = vpop.permute.xlu0 %1420  ;;  %v1233_v14 = vpop.permute.xlu1 %1232  ;;  %v1570_v19 = vsel %vm1559_vm9, %v1553_v60, %v3198_v30  ;;  %v3769_v30 = vld [vmem:[#allocation21_spill] sm:$0xff] }
 0x286   : > { %2411 = vmatprep.mubr.msk.f32.mxu1 %vm1588_vm10, %v1570_v19  ;;  %v1538_v33 = vsel %vm1525_vm7, %v1521_v61, %v3766_v27  ;;  %v1556_v56 = vsel %vm1542_vm8, %v1539_v11, %v3769_v30  ;;  %v1524_v45 = vsel %vm1508_vm6, %v3770_v58, %v1233_v14 }
 0x287   : > { %2412 = vmatmul.mubr.msk.f32.gmra.mxu1 %vm1588_vm10, %v1571_v44  ;;  %v1555_v38 = vsel %vm1542_vm8, %v1538_v33, %v3767_v22  ;;  %v1573_v18 = vsel %vm1559_vm9, %v1556_v56, %v1421_v53 }
 0x288   : > { %v1572_v9 = vsel %vm1559_vm9, %v1555_v38, %v3768_v5 }
 0x289   : > { %v1295_v62 = vpop.permute.xlu0 %1294  ;;  %v1297_v49 = vpop.permute.xlu1 %1296  ;;  %2414 = vmatprep.mubr.msk.f32.mxu1 %vm1588_vm10, %v1572_v9 }
 0x28a   : > { %v1540_v24 = vsel %vm1525_vm7, %v3771_v8, %v1295_v62  ;;  %v1541_v7 = vsel %vm1525_vm7, %v1524_v45, %v1297_v49  ;;  %v3586_v49 = vld [vmem:[%s3725_s7] ss:$0 sm:$0xff]  ;;  %v2006_v45 = vld [vmem:[%s2898_s29] sm:$0xff] }
 0x28b   : > { %2415 = vmatmul.mubr.msk.f32.gmra.mxu1 %vm1588_vm10, %v1573_v18 }
 0x28d   : > { %v1359_v63 = vpop.permute.xlu0 %1358  ;;  %v1361_v4 = vpop.permute.xlu1 %1360 }
 0x28e   : > { %v1557_v26 = vsel %vm1542_vm8, %v1540_v24, %v1359_v63  ;;  %v1558_v20 = vsel %vm1542_vm8, %v1541_v7, %v1361_v4  ;;  %v2007_v63 = vld [vmem:[%s2898_s29 + $0x8] sm:$0xff] }
 0x291   : > { %v1423_v0 = vpop.permute.xlu0 %1422  ;;  %v1425_v3 = vpop.permute.xlu1 %1424 }
 0x292   : > { %v1574_v35 = vsel %vm1559_vm9, %v1557_v26, %v1423_v0  ;;  %v1575_v46 = vsel %vm1559_vm9, %v1558_v20, %v1425_v3  ;;  %v2009_v26 = vld [vmem:[%s2898_s29 + $0x18] sm:$0xff] }
 0x293   : > { %2417 = vmatprep.mubr.msk.f32.mxu1 %vm1588_vm10, %v1574_v35 }
 0x294   : > { %2418 = vmatmul.mubr.msk.f32.gmra.mxu1 %vm1588_vm10, %v1575_v46  ;;  %v2008_v46 = vld [vmem:[%s2898_s29 + $0x10] sm:$0xff] }
 0x2eb   : > { %v2398_v28 = vpop.f32.mrf.mxu1 }
 0x2ec   : > { %v1713_v16 = vadd.f32 %v2398_v28, %v2241_v42 }
 0x2ed   : > { %v1707_v50 = vpop.f32.mrf.mxu1 }
 0x2ee   : > { %v1708_v6 = vadd.f32 %v2241_v42, %v1707_v50  ;;  %v1787_v10 = vmax.f32 %v1713_v16, 0.0 }
 0x2ef   : > { %v2401_v37 = vpop.f32.mrf.mxu1 }
 0x2f0   : > { %v1786_v25 = vmax.f32 %v1708_v6, 0.0  ;;  %v1723_v48 = vadd.f32 %v2401_v37, %v2241_v42 }
 0x2f1   : > { %v1717_v51 = vpop.f32.mrf.mxu1 }
 0x2f2   : > { %v1718_v15 = vadd.f32 %v2241_v42, %v1717_v51  ;;  %2422 = vmatprep.mubr.msk.f32.mxu0 %vm763_vm2, %v1786_v25  ;;  %v1789_v41 = vmax.f32 %v1723_v48, 0.0 }
 0x2f3   : > { %2423 = vmatmul.mubr.msk.f32.vlgmr.msra.gmra.mxu0 %vm763_vm2, %v1787_v10  ;;  %v2011_v10 = vld [vmem:[%s2898_s29 + $0x28] sm:$0xff] }
 0x2f4   : > { %v1788_v59 = vmax.f32 %v1718_v15, 0.0  ;;  %v2010_v15 = vld [vmem:[%s2898_s29 + $0x20] sm:$0xff] }
 0x2f6   : > { %2425 = vmatprep.mubr.msk.f32.mxu0 %vm763_vm2, %v1788_v59 }
 0x2f7   : > { %2426 = vmatmul.mubr.msk.f32.gmra.mxu0 %vm763_vm2, %v1789_v41 }
 0x300   : > { %v2404_v1 = vpop.f32.mrf.mxu1 }
 0x301   : > { %v1733_v47 = vadd.f32 %v2404_v1, %v2241_v42 }
 0x302   : > { %v1727_v57 = vpop.f32.mrf.mxu1 }
 0x303   : > { %v1728_v36 = vadd.f32 %v2241_v42, %v1727_v57  ;;  %v1791_v17 = vmax.f32 %v1733_v47, 0.0 }
 0x305   : > { %v1790_v31 = vmax.f32 %v1728_v36, 0.0 }
 0x307   : > { %2428 = vmatprep.mubr.msk.f32.mxu0 %vm763_vm2, %v1790_v31  ;;  %v2013_v31 = vld [vmem:[%s2898_s29 + $0x38] sm:$0xff] }
 0x308   : > { %2429 = vmatmul.mubr.msk.f32.gmra.mxu0 %vm763_vm2, %v1791_v17 }
 0x320   : > { %v2407_v32 = vpop.f32.mrf.mxu1 }
 0x321   : > { %v1743_v13 = vadd.f32 %v2407_v32, %v2241_v42 }
 0x322   : > { %v1737_v21 = vpop.f32.mrf.mxu1 }
 0x323   : > { %v1738_v39 = vadd.f32 %v2241_v42, %v1737_v21  ;;  %v1793_v54 = vmax.f32 %v1743_v13, 0.0  ;;  %v2012_v13 = vld [vmem:[%s2898_s29 + $0x30] sm:$0xff] }
 0x325   : > { %v1792_v43 = vmax.f32 %v1738_v39, 0.0 }
 0x327   : > { %2431 = vmatprep.mubr.msk.f32.mxu0 %vm763_vm2, %v1792_v43 }
 0x328   : > { %2432 = vmatmul.mubr.msk.f32.gmra.mxu0 %vm763_vm2, %v1793_v54 }
 0x340   : > { %v2410_v52 = vpop.f32.mrf.mxu1 }
 0x341   : > { %v1753_v23 = vadd.f32 %v2410_v52, %v2241_v42 }
 0x342   : > { %v1747_v55 = vpop.f32.mrf.mxu1 }
 0x343   : > { %v1748_v29 = vadd.f32 %v2241_v42, %v1747_v55  ;;  %v1795_v34 = vmax.f32 %v1753_v23, 0.0  ;;  %v2015_v55 = vld [vmem:[%s2898_s29 + $0x48] sm:$0xff] }
 0x345   : > { %v1794_v12 = vmax.f32 %v1748_v29, 0.0 }
 0x347   : > { %v2413_v60 = vpop.f32.mrf.mxu1  ;;  %2434 = vmatprep.mubr.msk.f32.mxu0 %vm763_vm2, %v1794_v12 }
 0x348   : > { %2435 = vmatmul.mubr.msk.f32.gmra.mxu0 %vm763_vm2, %v1795_v34  ;;  %v1763_v61 = vadd.f32 %v2413_v60, %v2241_v42  ;;  %v2014_v34 = vld [vmem:[%s2898_s29 + $0x40] sm:$0xff] }
 0x349   : > { %v1757_v53 = vpop.f32.mrf.mxu1 }
 0x34a   : > { %v1758_v14 = vadd.f32 %v2241_v42, %v1757_v53  ;;  %v1797_v11 = vmax.f32 %v1763_v61, 0.0 }
 0x34b   : > { %v2416_v19 = vpop.f32.mrf.mxu1 }
 0x34c   : > { %v1796_v40 = vmax.f32 %v1758_v14, 0.0  ;;  %v1773_v2 = vadd.f32 %v2416_v19, %v2241_v42 }
 0x34d   : > { %v1767_v44 = vpop.f32.mrf.mxu1 }
 0x34e   : > { %v1768_v27 = vadd.f32 %v2241_v42, %v1767_v44  ;;  %2437 = vmatprep.mubr.msk.f32.mxu0 %vm763_vm2, %v1796_v40  ;;  %v1799_v22 = vmax.f32 %v1773_v2, 0.0 }
 0x34f   : > { %2438 = vmatmul.mubr.msk.f32.gmra.mxu0 %vm763_vm2, %v1797_v11  ;;  %v2017_v11 = vld [vmem:[%s2898_s29 + $0x58] sm:$0xff] }
 0x350   : > { %v1798_v33 = vmax.f32 %v1768_v27, 0.0  ;;  %v2016_v27 = vld [vmem:[%s2898_s29 + $0x50] sm:$0xff] }
 0x352   : > { %2440 = vmatprep.mubr.msk.f32.mxu0 %vm763_vm2, %v1798_v33 }
 0x353   : > { %2441 = vmatmul.mubr.msk.f32.gmra.mxu0 %vm763_vm2, %v1799_v22 }
 0x354   : > { %v2419_v38 = vpop.f32.mrf.mxu1 }
 0x355   : > { %v1783_v5 = vadd.f32 %v2419_v38, %v2241_v42 }
 0x356   : > { %v1777_v9 = vpop.f32.mrf.mxu1 }
 0x357   : > { %v1778_v30 = vadd.f32 %v2241_v42, %v1777_v9  ;;  %v1801_v62 = vmax.f32 %v1783_v5, 0.0  ;;  %v2019_v5 = vld [vmem:[%s2898_s29 + $0x68] sm:$0xff] }
 0x359   : > { %v1800_v56 = vmax.f32 %v1778_v30, 0.0 }
 0x35b   : > { %2443 = vmatprep.mubr.msk.f32.mxu0 %vm763_vm2, %v1800_v56 }
 0x35c   : > { %2444 = vmatmul.mubr.msk.f32.gmra.mxu0 %vm763_vm2, %v1801_v62 }
 0x3b3   : > { %v2424_v18 = vpop.f32.mrf.mxu0 }
 0x3b4   : > { %v1933_v4 = vadd.f32 %v2424_v18, %v3586_v49  ;;  %v2018_v18 = vld [vmem:[%s2898_s29 + $0x60] sm:$0xff] }
 0x3b5   : > { %v1927_v58 = vpop.f32.mrf.mxu0 }
 0x3b6   : > { %v2023_v8 = vadd.f32 %v2007_v63, %v1933_v4  ;;  %v1928_v24 = vadd.f32 %v3586_v49, %v1927_v58 }
 0x3b7   : > { %v2427_v7 = vpop.f32.mrf.mxu0 }
 0x3b8   : > { %v2039_v20 = vmax.f32 %v2023_v8, 0.0  ;;  %v2022_v0 = vadd.f32 %v2006_v45, %v1928_v24  ;;  %v1943_v3 = vadd.f32 %v2427_v7, %v3586_v49 }
 0x3b9   : > { %v1937_v35 = vpop.f32.mrf.mxu0 }
 0x3ba   : > { %2055 = vst.msk [vmem:[%s3597_s13 + $0x8] sm:$0xff] %vm414_vm0, %v2039_v20  ;;  %v2038_v42 = vmax.f32 %v2022_v0, 0.0  ;;  %v2025_v28 = vadd.f32 %v2009_v26, %v1943_v3  ;;  %v1938_v16 = vadd.f32 %v3586_v49, %v1937_v35  ;;  %v2021_v26 = vld [vmem:[%s2898_s29 + $0x78] sm:$0xff]  ;;  %v2020_v3 = vld [vmem:[%s2898_s29 + $0x70] sm:$0xff]  ;;  %s2071_s29 = scalar_lea.sflag [#allocation5], %s2892_s25 }
 0x3bc   : > { %2054 = vst.msk [vmem:[%s3597_s13] sm:$0xff] %vm414_vm0, %v2038_v42  ;;  %v2041_v50 = vmax.f32 %v2025_v28, 0.0  ;;  %v2024_v6 = vadd.f32 %v2008_v46, %v1938_v16 }
 0x3be   : > { %2057 = vst.msk [vmem:[%s3597_s13 + $0x18] sm:$0xff] %vm414_vm0, %v2041_v50  ;;  %v2040_v37 = vmax.f32 %v2024_v6, 0.0 }
 0x3c0   : > { %2056 = vst.msk [vmem:[%s3597_s13 + $0x10] sm:$0xff] %vm414_vm0, %v2040_v37 }
 0x3c8   : > { %v2430_v25 = vpop.f32.mrf.mxu0 }
 0x3c9   : > { %v1953_v48 = vadd.f32 %v2430_v25, %v3586_v49 }
 0x3ca   : > { %v1947_v51 = vpop.f32.mrf.mxu0 }
 0x3cb   : > { %v2027_v59 = vadd.f32 %v2011_v10, %v1953_v48  ;;  %v1948_v41 = vadd.f32 %v3586_v49, %v1947_v51 }
 0x3cd   : > { %v2043_v1 = vmax.f32 %v2027_v59, 0.0  ;;  %v2026_v47 = vadd.f32 %v2010_v15, %v1948_v41 }
 0x3cf   : > { %2059 = vst.msk [vmem:[%s3597_s13 + $0x28] sm:$0xff] %vm414_vm0, %v2043_v1  ;;  %v2042_v57 = vmax.f32 %v2026_v47, 0.0 }
 0x3d1   : > { %2058 = vst.msk [vmem:[%s3597_s13 + $0x20] sm:$0xff] %vm414_vm0, %v2042_v57 }
 0x3e8   : > { %v2433_v36 = vpop.f32.mrf.mxu0 }
 0x3e9   : > { %v1963_v17 = vadd.f32 %v2433_v36, %v3586_v49 }
 0x3ea   : > { %v1957_v32 = vpop.f32.mrf.mxu0 }
 0x3eb   : > { %v2029_v21 = vadd.f32 %v2013_v31, %v1963_v17  ;;  %v1958_v39 = vadd.f32 %v3586_v49, %v1957_v32 }
 0x3ed   : > { %v2045_v43 = vmax.f32 %v2029_v21, 0.0  ;;  %v2028_v54 = vadd.f32 %v2012_v13, %v1958_v39 }
 0x3ef   : > { %2061 = vst.msk [vmem:[%s3597_s13 + $0x38] sm:$0xff] %vm414_vm0, %v2045_v43  ;;  %v2044_v52 = vmax.f32 %v2028_v54, 0.0 }
 0x3f1   : > { %2060 = vst.msk [vmem:[%s3597_s13 + $0x30] sm:$0xff] %vm414_vm0, %v2044_v52 }
 0x408   : > { %v2436_v23 = vpop.f32.mrf.mxu0 }
 0x409   : > { %v1973_v29 = vadd.f32 %v2436_v23, %v3586_v49 }
 0x40a   : > { %v1967_v12 = vpop.f32.mrf.mxu0 }
 0x40b   : > { %v2031_v60 = vadd.f32 %v2015_v55, %v1973_v29  ;;  %v1968_v61 = vadd.f32 %v3586_v49, %v1967_v12 }
 0x40d   : > { %v2047_v53 = vmax.f32 %v2031_v60, 0.0  ;;  %v2030_v14 = vadd.f32 %v2014_v34, %v1968_v61 }
 0x40f   : > { %2063 = vst.msk [vmem:[%s3597_s13 + $0x48] sm:$0xff] %vm414_vm0, %v2047_v53  ;;  %v2046_v19 = vmax.f32 %v2030_v14, 0.0  ;;  %v2439_v40 = vpop.f32.mrf.mxu0 }
 0x410   : > { %v1983_v2 = vadd.f32 %v2439_v40, %v3586_v49 }
 0x411   : > { %2062 = vst.msk [vmem:[%s3597_s13 + $0x40] sm:$0xff] %vm414_vm0, %v2046_v19  ;;  %v1977_v44 = vpop.f32.mrf.mxu0 }
 0x412   : > { %v2033_v33 = vadd.f32 %v2017_v11, %v1983_v2  ;;  %v1978_v22 = vadd.f32 %v3586_v49, %v1977_v44 }
 0x413   : > { %v2442_v38 = vpop.f32.mrf.mxu0 }
 0x414   : > { %v2049_v9 = vmax.f32 %v2033_v33, 0.0  ;;  %v2032_v30 = vadd.f32 %v2016_v27, %v1978_v22  ;;  %v1993_v56 = vadd.f32 %v2442_v38, %v3586_v49 }
 0x415   : > { %v1987_v62 = vpop.f32.mrf.mxu0 }
 0x416   : > { %2065 = vst.msk [vmem:[%s3597_s13 + $0x58] sm:$0xff] %vm414_vm0, %v2049_v9  ;;  %v2048_v63 = vmax.f32 %v2032_v30, 0.0  ;;  %v2035_v4 = vadd.f32 %v2019_v5, %v1993_v56  ;;  %v1988_v58 = vadd.f32 %v3586_v49, %v1987_v62 }
 0x418   : > { %2064 = vst.msk [vmem:[%s3597_s13 + $0x50] sm:$0xff] %vm414_vm0, %v2048_v63  ;;  %v2051_v45 = vmax.f32 %v2035_v4, 0.0  ;;  %v2034_v8 = vadd.f32 %v2018_v18, %v1988_v58 }
 0x41a   : > { %2067 = vst.msk [vmem:[%s3597_s13 + $0x68] sm:$0xff] %vm414_vm0, %v2051_v45  ;;  %v2050_v24 = vmax.f32 %v2034_v8, 0.0 }
 0x41c   : > { %2066 = vst.msk [vmem:[%s3597_s13 + $0x60] sm:$0xff] %vm414_vm0, %v2050_v24  ;;  %v2445_v7 = vpop.f32.mrf.mxu0 }
 0x41d   : > { %v2003_v20 = vadd.f32 %v2445_v7, %v3586_v49 }
 0x41e   : > { %v1997_v0 = vpop.f32.mrf.mxu0 }
 0x41f   : > { %v2037_v35 = vadd.f32 %v2021_v26, %v2003_v20  ;;  %v1998_v46 = vadd.f32 %v3586_v49, %v1997_v0 }
 0x421   : > { %v2053_v42 = vmax.f32 %v2037_v35, 0.0  ;;  %v2036_v28 = vadd.f32 %v2020_v3, %v1998_v46 }
 0x423   : > { %2069 = vst.msk [vmem:[%s3597_s13 + $0x78] sm:$0xff] %vm414_vm0, %v2053_v42  ;;  %v2052_v16 = vmax.f32 %v2036_v28, 0.0 }
 0x425   : > { %2068 = vst.msk [vmem:[%s3597_s13 + $0x70] sm:$0xff] %vm414_vm0, %v2052_v16 }
 0x426   : > { %2614 = shalt.err (!%p2611_p6)
}
 0x427   : > { %s2615_s18 = scalar_lea.hbm %s3658_s26, 2048  ;;  %s2619_s20 = scalar_lea.hbm %s3774_s8, 8192 }
 0x428   : > { %p2616_p7 = scmp.ne.s32.totalorder %s3658_s26, %s2615_s18  ;;  %p2620_p8 = scmp.lt.s32.totalorder %s3658_s26, %s3774_s8 }
 0x429   : > { %p2621_p0 = scmp.lt.s32.totalorder %s2619_s20, %s2615_s18 }
 0x42a   : > { %p2617_p10 = pnand %p2616_p7, %p2828_p9 }
 0x42b   : > { %p2622_p1 = por %p2621_p0, %p2620_p8 }
 0x42c   : > { %p2618_p11 = pneg %p2617_p10 }
 0x42e   : > { %p2623_p13 = pnand %p2622_p1, %p2618_p11 }
 0x430   : > { %2626 = shalt.err (!%p2623_p13)
}
 0x431   : > { %s2717_s30 = smov 128  }
 0x432   : > { %2454 = dma.vmem_to_hbm [thread:$0]  (%p2828_p9), %s3662_s14, 2048, %s3658_s26, %s2071_s29, %s2717_s30, %s2717_s30, %s2713_s9  }
 0x433 PF: > { %s3775_s22 = sld [smem:[#allocation12_spill]]  ;;  %p2468_p2 = scmp.ge.s32.totalorder %s2701_s12, 2 }
 0x435   : > { %p2464_p4 = pnand %p2468_p2, %p2834_p12 }
 0x437   : > { %p2465_p5 = pneg %p2464_p4 }
 0x439   : > { %s2102_s17 = sand.u32 1, %s3775_s22  }
 0x43a   : > { %s2103_s0 = scalar_lea.sflag [#allocation5], %s2102_s17 }
 0x43b   : > { %2668 = dma.done.wait (%p2465_p5), %s2103_s0, 2048  }
 0x43c   : > { %2670 = vsyncadd (%p2465_p5), %s2103_s0, 4294965248  ;;  %s27_s12 = sadd.s32 1, %s2701_s12   ;;  %s3777_s25 = sld [smem:[#allocation13_spill]] }
 0x43d   : > { %p24_p3 = scmp.ge.s32.totalorder %s27_s12, 6   ;;  %s3778_s29 = sld [smem:[#allocation19_spill]] }
 0x43e   : > { %s3779_s16 = sld [smem:[#allocation15_spill]]  ;;  %s3781_s27 = smov %s2677_s28 }
 0x43f   : > { %s3780_s14 = sld [smem:[#allocation16_spill]]  ;;  %s3783_s30 = smov %s2693_s10 }
 0x440   : > { %s3784_s9 = smov %s2697_s11 }
 0x441   :  { %26 = sbr.rel (!%p24_p3) target bundleno = 12 (0xc), region = 113 }
 0x442   : > { %s3782_s28 = smov %s3777_s25 }
 0x444   : > { %s3785_s10 = smov %s3779_s16 }
 0x445   : > { %s3786_s11 = smov %s3780_s14 }
 0x446   :  { %2108 = vsyncpa [#allocation4], 1 }
 0x447   :  { %2110 = vsyncpa [#allocation4 + $0x1], 1 }
 0x448   :  { %2111 = vsyncpa [#allocation7], 1 }
 0x449   :  { %2113 = vsyncpa [#allocation7 + $0x1], 1 }
 0x44a   :  { %2114 = vsyncpa [#allocation5], 1 }
 0x44b   :  { %2116 = vsyncpa [#allocation5 + $0x1], 1 }

</bundles_post_ra>
